<compile_context>
chip_gen: v5e
topology: v5e:2x2
jax: 0.10.0
libtpu: 0.0.40
codegen_flags: <defaults>
</compile_context>

<pallas_src>
import jax
import jax.numpy as jnp
from jax import lax
from jax.experimental import pallas as pl
from jax.experimental.pallas import tpu as pltpu

_FALLBACK_VMEM = 64 * 1024 * 1024     # used only if the hardware query fails


# --------------------------------------------------------------------------- #
# VMEM budgeting (generation-aware: v5e/v6e have 128 MiB, v7x 64 MiB).         #
# --------------------------------------------------------------------------- #
def _vmem_budget_and_limit():
    cap = None
    try:
        cap = getattr(pltpu.get_tpu_info(), "vmem_capacity_bytes", None)
    except Exception:
        cap = None
    cap = int(cap) if cap else _FALLBACK_VMEM
    return int(cap * 0.70), int(cap * 0.85)


# --------------------------------------------------------------------------- #
# Phase folding: 3x3 conv over nearest-2x == four 2x2 kernels on the original. #
# --------------------------------------------------------------------------- #
def _tap_phases(dr, dc):
    """Output phases (a, b) fed by the source tap at padded offset (dr, dc)."""
    return [(a, b) for a in (0, 1) for b in (0, 1)
            if 0 <= dr - a <= 1 and 0 <= dc - b <= 1]


def _fold_packed_weights(weight_oihw, compute_dtype, aligned):
    """Fold the 3x3 kernel and pack per-tap phase blocks along the output dim.

    Returns (9, C_in, 4*C_out):
      aligned=True : tap t's contributing phase blocks packed left-justified
                     (kernel slices them out with 128-aligned slices).
      aligned=False: each phase block sits at its final column p*C_out with zero
                     blocks elsewhere (kernel does no slicing / concatenation).
    """
    c_out, c_in = int(weight_oihw.shape[0]), int(weight_oihw.shape[1])
    w_hwio = jnp.transpose(weight_oihw, (2, 3, 1, 0)).astype(jnp.float32)
    # M[a, r, kh]: which 3x3 row taps collapse onto source-row offset r for output
    # phase a (from floor((2i + a + kh - 1) / 2)).  Same matrix for columns.
    M = jnp.array([[[1., 0., 0.], [0., 1., 1.]],
                   [[1., 1., 0.], [0., 0., 1.]]], dtype=jnp.float32)
    fw = jnp.einsum("arh,bcw,hwio->abrcio", M, M, w_hwio)   # (2,2,2,2,Cin,Cout)
    taps = []
    for dr in range(3):
        for dc in range(3):
            phs = _tap_phases(dr, dc)
            if aligned:
                blocks = [fw[a, b, dr - a, dc - b] for (a, b) in phs]
                packed = jnp.concatenate(blocks, axis=1)
                packed = jnp.pad(packed,
                                 ((0, 0), (0, 4 * c_out - packed.shape[1])))
            else:
                cols = []
                for p in range(4):
                    a, b = divmod(p, 2)
                    if (a, b) in phs:
                        cols.append(fw[a, b, dr - a, dc - b])
                    else:
                        cols.append(jnp.zeros((c_in, c_out), jnp.float32))
                packed = jnp.concatenate(cols, axis=1)
            taps.append(packed)
    return jnp.stack(taps, axis=0).astype(compute_dtype)     # (9, Cin, 4*Cout)


# --------------------------------------------------------------------------- #
# Fused upsample+conv kernel: one (batch, row-block) grid step.                #
# --------------------------------------------------------------------------- #
def _make_conv_kernel(W, C, th, aligned):
    def kernel(x_ref, wf_ref, b_ref, o_ref):
        # x_ref : (1, H+2, W+2, C)  zero-padded ORIGINAL-res image (compute dtype)
        # wf_ref: (9, C, 4C)        per-tap phase-packed folded weights
        # b_ref : (1, 4C)           f32 bias (tiled over the 4 phases)
        # o_ref : (1, th, W, 4C)    lane-dense phase-packed output row block
        row0 = pl.multiple_of(pl.program_id(1) * th, th)
        sums = [None, None, None, None]   # per-phase traced accumulators (aligned)
        acc = None                        # full-width accumulator (dense mode)
        t = 0
        for dr in range(3):
            for dc in range(3):
                phs = _tap_phases(dr, dc)
                patch = x_ref[0, pl.ds(row0 + dr, th), pl.ds(dc, W), :]
                # TODO(synk): a rank-3 dot_general (contracting only C) would skip
                # the reshape relayout of this strided W-slice; kept 2-D for
                # guaranteed Mosaic lowering.
                patch = patch.reshape(th * W, C)
                if aligned:
                    k = len(phs)
                    wt = wf_ref[t, :, 0:k * C]
                    res = jnp.dot(patch, wt, preferred_element_type=jnp.float32)
                    for idx, (a, b) in enumerate(phs):
                        p = a * 2 + b
                        part = res[:, idx * C:(idx + 1) * C]
                        sums[p] = part if sums[p] is None else sums[p] + part
                else:
                    res = jnp.dot(patch, wf_ref[t],
                                  preferred_element_type=jnp.float32)
                    acc = res if acc is None else acc + res
                t += 1
        out = jnp.concatenate(sums, axis=-1) if aligned else acc   # (th*W, 4C)
        out = out + b_ref[...]
        o_ref[0] = out.reshape(th, W, 4 * C).astype(o_ref.dtype)
    return kernel


def _conv_vmem_bytes(H, W, C, th, in_bytes, out_bytes):
    x_blk = 2 * (H + 2) * (W + 2) * C * in_bytes    # resident input (2 buffers)
    w_blk = 2 * 9 * C * (4 * C) * in_bytes          # packed folded weights
    o_blk = 2 * th * W * (4 * C) * out_bytes        # double-buffered output tile
    tmp = 14 * th * W * C * 4                       # live f32 temporaries (sums/res)
    return x_blk + w_blk + o_blk + tmp + (2 << 20)


def _pick_row_tile(H, W, C, in_bytes, out_bytes, budget):
    divisors = [d for d in range(1, H + 1) if H % d == 0]
    fitting = [d for d in divisors
               if _conv_vmem_bytes(H, W, C, d, in_bytes, out_bytes) <= budget]
    if not fitting:
        return None
    multi = [d for d in fitting if d < H]   # prefer >= 2 row blocks (pipelining)
    return max(multi) if (multi and H > 8) else max(fitting)


def _upsample_conv_pallas(x_nhwc, weight_oihw, bias, compute_dtype, th, vmem_limit):
    N, H, W, C = x_nhwc.shape
    out_dtype = x_nhwc.dtype
    aligned = (C % 128 == 0)   # 128-aligned phase slices / concat are free

    xp = jnp.pad(x_nhwc.astype(compute_dtype), ((0, 0), (1, 1), (1, 1), (0, 0)))
    wf = _fold_packed_weights(weight_oihw, compute_dtype, aligned)
    b4 = jnp.tile(bias.astype(jnp.float32), 4).reshape(1, 4 * C)

    kernel = _make_conv_kernel(W, C, th, aligned)
    return pl.pallas_call(
        kernel,
        out_shape=jax.ShapeDtypeStruct((N, H, W, 4 * C), out_dtype),
        grid_spec=pltpu.PrefetchScalarGridSpec(
            num_scalar_prefetch=0,
            grid=(N, H // th),
            in_specs=[
                # Padded ORIGINAL-res image: block index is constant across the row
                # axis -> stays VMEM-resident, re-DMA'd only when n changes.
                # TODO(synk): halo-row manual DMA (pl.ANY + make_async_copy) so VMEM
                # scales with th instead of H*W for very large images.
                pl.BlockSpec((1, H + 2, W + 2, C), lambda n, r: (n, 0, 0, 0)),
                # Folded weights / bias: constant blocks, never re-fetched.
                pl.BlockSpec((9, C, 4 * C), lambda n, r: (0, 0, 0)),
                pl.BlockSpec((1, 4 * C), lambda n, r: (0, 0)),
            ],
            out_specs=pl.BlockSpec((1, th, W, 4 * C), lambda n, r: (n, r, 0, 0)),
        ),
        compiler_params=pltpu.CompilerParams(
            dimension_semantics=("parallel", "parallel"),
            vmem_limit_bytes=vmem_limit,
        ),
    )(xp, wf, b4)        # (N, H, W, 4C); last dim = (a, b, C), phase p = a*2+b


# --------------------------------------------------------------------------- #
# with_conv=False path and oversized-image fallback.                           #
# --------------------------------------------------------------------------- #
def _upsample_nearest2x_nchw(x_nchw):
    # Pure nearest-2x: one fused XLA broadcast+reshape (single HBM pass).  A Pallas
    # kernel here would only add an extra pass for a purely bandwidth-bound copy.
    N, C, H, W = x_nchw.shape
    out = jnp.broadcast_to(x_nchw[:, :, :, None, :, None], (N, C, H, 2, W, 2))
    return out.reshape(N, C, 2 * H, 2 * W)


def _xla_upsample_conv(x_nchw, weight_oihw, bias):
    # Fallback for images whose padded rows exceed the resident-input VMEM budget.
    # TODO(synk): replace with halo-row manual-DMA Pallas tiling.
    x = _upsample_nearest2x_nchw(x_nchw)
    y = lax.conv_general_dilated(x, weight_oihw, (1, 1), ((1, 1), (1, 1)),
                                 dimension_numbers=("NCHW", "OIHW", "NCHW"))
    return y + bias.reshape(1, -1, 1, 1)


# --------------------------------------------------------------------------- #
# Public forward (matches torch Upsample.forward semantics, NCHW in/out).      #
# --------------------------------------------------------------------------- #
def upsample_forward(x_nchw, weight_oihw=None, bias=None, with_conv=True,
                     compute_dtype=jnp.bfloat16):
    """x_nchw: (N,C,H,W); weight: (C,C,3,3) OIHW; bias: (C,). Returns (N,C,2H,2W).

    Note: the conv matmuls run in `compute_dtype` (bf16 by default) with f32
    accumulation; pass compute_dtype=jnp.float32 for full-precision conv.
    """
    N, C, H, W = x_nchw.shape
    if not with_conv:
        return _upsample_nearest2x_nchw(x_nchw)

    budget, limit = _vmem_budget_and_limit()
    th = _pick_row_tile(H, W, C, jnp.dtype(compute_dtype).itemsize,
                        jnp.dtype(x_nchw.dtype).itemsize, budget)
    if th is None:
        return _xla_upsample_conv(x_nchw, weight_oihw, bias)

    # NCHW -> NHWC (channels on lanes for the MXU).
    # TODO(synk): accept/return NHWC end-to-end to drop the boundary transposes.
    x_nhwc = jnp.transpose(x_nchw, (0, 2, 3, 1))
    out = _upsample_conv_pallas(x_nhwc, weight_oihw, bias, compute_dtype, th, limit)
    # (N,H,W,4C) -> (N,H,W,2,2,C) -> (N,C,H,2,W,2) -> (N,C,2H,2W): ONE transpose
    # does BOTH the 2x2 phase interleave and the NHWC->NCHW conversion.
    out = out.reshape(N, H, W, 2, 2, C)
    return jnp.transpose(out, (0, 5, 1, 3, 2, 4)).reshape(N, C, 2 * H, 2 * W)


def _reference_forward(x_nchw, weight_oihw, bias, with_conv=True):
    """Pure-JAX reference (mirrors torch interpolate+conv) for validation."""
    x = jnp.repeat(jnp.repeat(x_nchw, 2, axis=2), 2, axis=3)
    if with_conv:
        x = lax.conv_general_dilated(
            x, weight_oihw, window_strides=(1, 1), padding=((1, 1), (1, 1)),
            dimension_numbers=("NCHW", "OIHW", "NCHW"))
        x = x + bias.reshape(1, -1, 1, 1)
    return x


if __name__ == "__main__":
    key = jax.random.PRNGKey(0)
    k_x, k_w, k_b, k_x2, k_w2, k_b2 = jax.random.split(key, 6)

    # Small shapes consistent with the module (PyTorch-style Conv2d init scale).
    N, C, H, W = 2, 4, 16, 16
    x = jax.random.normal(k_x, (N, C, H, W), dtype=jnp.float32)
    bound = 1.0 / (C * 9) ** 0.5
    weight = jax.random.uniform(k_w, (C, C, 3, 3), jnp.float32, -bound, bound)
    bias = jax.random.uniform(k_b, (C,), jnp.float32, -bound, bound)

    out = jax.block_until_ready(upsample_forward(x, weight, bias, with_conv=True))
    ref = _reference_forward(x, weight, bias, with_conv=True)
    assert out.shape == (N, C, 2 * H, 2 * W), out.shape
    assert jnp.allclose(out, ref, atol=2e-2, rtol=2e-2), \
        float(jnp.max(jnp.abs(out - ref)))

    # with_conv=False path (pure nearest-2x, exact).
    out_nc = jax.block_until_ready(upsample_forward(x, with_conv=False))
    ref_nc = _reference_forward(x, None, None, with_conv=False)
    assert bool(jnp.array_equal(out_nc, ref_nc))

    # Lane-dense check (C=128) exercising the aligned phase-packed MXU path.
    N2, C2, H2, W2 = 1, 128, 32, 32
    x2 = jax.random.normal(k_x2, (N2, C2, H2, W2), dtype=jnp.float32)
    bound2 = 1.0 / (C2 * 9) ** 0.5
    w2 = jax.random.uniform(k_w2, (C2, C2, 3, 3), jnp.float32, -bound2, bound2)
    b2 = jax.random.uniform(k_b2, (C2,), jnp.float32, -bound2, bound2)
    out2 = jax.block_until_ready(upsample_forward(x2, w2, b2, with_conv=True))
    ref2 = _reference_forward(x2, w2, b2, with_conv=True)
    assert jnp.allclose(out2, ref2, atol=2e-2, rtol=2e-2), \
        float(jnp.max(jnp.abs(out2 - ref2)))

    print("KERNEL_OK")
</pallas_src>

<mosaic_0001>
module attributes {stable_mosaic.version = 11 : i64} {
  func.func @kernel(%arg0: i32, %arg1: i32, %arg2: memref<1x18x18x4xbf16, #tpu.memory_space<vmem>>, %arg3: memref<9x4x16xbf16, #tpu.memory_space<vmem>>, %arg4: memref<1x16xf32, #tpu.memory_space<vmem>>, %arg5: memref<1x8x16x16xf32, #tpu.memory_space<vmem>>) attributes {dimension_semantics = [#tpu.dimension_semantics<parallel>, #tpu.dimension_semantics<parallel>], iteration_bounds = array<i64: 2, 2>, scalar_prefetch = 0 : i64, scratch_operands = 0 : i64, tpu.core_type = #tpu.core_type<tc>, window_params = [{transform_indices = @transform_0, window_bounds = array<i64: 1, 18, 18, 4>}, {pipeline_mode = #tpu.pipeline_mode<synchronous>, transform_indices = @transform_1, window_bounds = array<i64: 9, 4, 16>}, {pipeline_mode = #tpu.pipeline_mode<synchronous>, transform_indices = @transform_2, window_bounds = array<i64: 1, 16>}, {transform_indices = @transform_3, window_bounds = array<i64: 1, 8, 16, 16>}]} {
    %c8_i32 = arith.constant 8 : i32
    %0 = arith.muli %arg1, %c8_i32 : i32
    %1 = tpu.assume_multiple %0, 8 : i32
    %c0_i32 = arith.constant 0 : i32
    %2 = arith.addi %1, %c0_i32 : i32
    %c0 = arith.constant 0 : index
    %3 = arith.index_cast %2 : i32 to index
    %c0_0 = arith.constant 0 : index
    %c0_1 = arith.constant 0 : index
    %4 = vector.load %arg2[%c0, %3, %c0_0, %c0_1] : memref<1x18x18x4xbf16, #tpu.memory_space<vmem>>, vector<1x8x16x4xbf16>
    %5 = vector.shape_cast %4 : vector<1x8x16x4xbf16> to vector<8x16x4xbf16>
    %6 = vector.shape_cast %5 : vector<8x16x4xbf16> to vector<128x4xbf16>
    %c0_2 = arith.constant 0 : index
    %c0_3 = arith.constant 0 : index
    %c0_4 = arith.constant 0 : index
    %7 = vector.load %arg3[%c0_2, %c0_3, %c0_4] : memref<9x4x16xbf16, #tpu.memory_space<vmem>>, vector<1x4x16xbf16>
    %8 = vector.shape_cast %7 : vector<1x4x16xbf16> to vector<4x16xbf16>
    %cst = arith.constant dense<0.000000e+00> : vector<128x16xf32>
    %9 = tpu.matmul %6, %8, %cst {dimension_numbers = #tpu.dot_dimension_numbers<[1], [0], [0], [1], [0, 0, 1, 1], [], []>} : vector<128x4xbf16>, vector<4x16xbf16>, vector<128x16xf32> -> vector<128x16xf32>
    %c0_i32_5 = arith.constant 0 : i32
    %10 = arith.addi %1, %c0_i32_5 : i32
    %c0_6 = arith.constant 0 : index
    %11 = arith.index_cast %10 : i32 to index
    %c1 = arith.constant 1 : index
    %c0_7 = arith.constant 0 : index
    %12 = vector.load %arg2[%c0_6, %11, %c1, %c0_7] : memref<1x18x18x4xbf16, #tpu.memory_space<vmem>>, vector<1x8x16x4xbf16>
    %13 = vector.shape_cast %12 : vector<1x8x16x4xbf16> to vector<8x16x4xbf16>
    %14 = vector.shape_cast %13 : vector<8x16x4xbf16> to vector<128x4xbf16>
    %c1_8 = arith.constant 1 : index
    %c0_9 = arith.constant 0 : index
    %c0_10 = arith.constant 0 : index
    %15 = vector.load %arg3[%c1_8, %c0_9, %c0_10] : memref<9x4x16xbf16, #tpu.memory_space<vmem>>, vector<1x4x16xbf16>
    %16 = vector.shape_cast %15 : vector<1x4x16xbf16> to vector<4x16xbf16>
    %cst_11 = arith.constant dense<0.000000e+00> : vector<128x16xf32>
    %17 = tpu.matmul %14, %16, %cst_11 {dimension_numbers = #tpu.dot_dimension_numbers<[1], [0], [0], [1], [0, 0, 1, 1], [], []>} : vector<128x4xbf16>, vector<4x16xbf16>, vector<128x16xf32> -> vector<128x16xf32>
    %18 = arith.addf %9, %17 : vector<128x16xf32>
    %c0_i32_12 = arith.constant 0 : i32
    %19 = arith.addi %1, %c0_i32_12 : i32
    %c0_13 = arith.constant 0 : index
    %20 = arith.index_cast %19 : i32 to index
    %c2 = arith.constant 2 : index
    %c0_14 = arith.constant 0 : index
    %21 = vector.load %arg2[%c0_13, %20, %c2, %c0_14] : memref<1x18x18x4xbf16, #tpu.memory_space<vmem>>, vector<1x8x16x4xbf16>
    %22 = vector.shape_cast %21 : vector<1x8x16x4xbf16> to vector<8x16x4xbf16>
    %23 = vector.shape_cast %22 : vector<8x16x4xbf16> to vector<128x4xbf16>
    %c2_15 = arith.constant 2 : index
    %c0_16 = arith.constant 0 : index
    %c0_17 = arith.constant 0 : index
    %24 = vector.load %arg3[%c2_15, %c0_16, %c0_17] : memref<9x4x16xbf16, #tpu.memory_space<vmem>>, vector<1x4x16xbf16>
    %25 = vector.shape_cast %24 : vector<1x4x16xbf16> to vector<4x16xbf16>
    %cst_18 = arith.constant dense<0.000000e+00> : vector<128x16xf32>
    %26 = tpu.matmul %23, %25, %cst_18 {dimension_numbers = #tpu.dot_dimension_numbers<[1], [0], [0], [1], [0, 0, 1, 1], [], []>} : vector<128x4xbf16>, vector<4x16xbf16>, vector<128x16xf32> -> vector<128x16xf32>
    %27 = arith.addf %18, %26 : vector<128x16xf32>
    %c1_i32 = arith.constant 1 : i32
    %28 = arith.addi %1, %c1_i32 : i32
    %c0_19 = arith.constant 0 : index
    %29 = arith.index_cast %28 : i32 to index
    %c0_20 = arith.constant 0 : index
    %c0_21 = arith.constant 0 : index
    %30 = vector.load %arg2[%c0_19, %29, %c0_20, %c0_21] : memref<1x18x18x4xbf16, #tpu.memory_space<vmem>>, vector<1x8x16x4xbf16>
    %31 = vector.shape_cast %30 : vector<1x8x16x4xbf16> to vector<8x16x4xbf16>
    %32 = vector.shape_cast %31 : vector<8x16x4xbf16> to vector<128x4xbf16>
    %c3 = arith.constant 3 : index
    %c0_22 = arith.constant 0 : index
    %c0_23 = arith.constant 0 : index
    %33 = vector.load %arg3[%c3, %c0_22, %c0_23] : memref<9x4x16xbf16, #tpu.memory_space<vmem>>, vector<1x4x16xbf16>
    %34 = vector.shape_cast %33 : vector<1x4x16xbf16> to vector<4x16xbf16>
    %cst_24 = arith.constant dense<0.000000e+00> : vector<128x16xf32>
    %35 = tpu.matmul %32, %34, %cst_24 {dimension_numbers = #tpu.dot_dimension_numbers<[1], [0], [0], [1], [0, 0, 1, 1], [], []>} : vector<128x4xbf16>, vector<4x16xbf16>, vector<128x16xf32> -> vector<128x16xf32>
    %36 = arith.addf %27, %35 : vector<128x16xf32>
    %c1_i32_25 = arith.constant 1 : i32
    %37 = arith.addi %1, %c1_i32_25 : i32
    %c0_26 = arith.constant 0 : index
    %38 = arith.index_cast %37 : i32 to index
    %c1_27 = arith.constant 1 : index
    %c0_28 = arith.constant 0 : index
    %39 = vector.load %arg2[%c0_26, %38, %c1_27, %c0_28] : memref<1x18x18x4xbf16, #tpu.memory_space<vmem>>, vector<1x8x16x4xbf16>
    %40 = vector.shape_cast %39 : vector<1x8x16x4xbf16> to vector<8x16x4xbf16>
    %41 = vector.shape_cast %40 : vector<8x16x4xbf16> to vector<128x4xbf16>
    %c4 = arith.constant 4 : index
    %c0_29 = arith.constant 0 : index
    %c0_30 = arith.constant 0 : index
    %42 = vector.load %arg3[%c4, %c0_29, %c0_30] : memref<9x4x16xbf16, #tpu.memory_space<vmem>>, vector<1x4x16xbf16>
    %43 = vector.shape_cast %42 : vector<1x4x16xbf16> to vector<4x16xbf16>
    %cst_31 = arith.constant dense<0.000000e+00> : vector<128x16xf32>
    %44 = tpu.matmul %41, %43, %cst_31 {dimension_numbers = #tpu.dot_dimension_numbers<[1], [0], [0], [1], [0, 0, 1, 1], [], []>} : vector<128x4xbf16>, vector<4x16xbf16>, vector<128x16xf32> -> vector<128x16xf32>
    %45 = arith.addf %36, %44 : vector<128x16xf32>
    %c1_i32_32 = arith.constant 1 : i32
    %46 = arith.addi %1, %c1_i32_32 : i32
    %c0_33 = arith.constant 0 : index
    %47 = arith.index_cast %46 : i32 to index
    %c2_34 = arith.constant 2 : index
    %c0_35 = arith.constant 0 : index
    %48 = vector.load %arg2[%c0_33, %47, %c2_34, %c0_35] : memref<1x18x18x4xbf16, #tpu.memory_space<vmem>>, vector<1x8x16x4xbf16>
    %49 = vector.shape_cast %48 : vector<1x8x16x4xbf16> to vector<8x16x4xbf16>
    %50 = vector.shape_cast %49 : vector<8x16x4xbf16> to vector<128x4xbf16>
    %c5 = arith.constant 5 : index
    %c0_36 = arith.constant 0 : index
    %c0_37 = arith.constant 0 : index
    %51 = vector.load %arg3[%c5, %c0_36, %c0_37] : memref<9x4x16xbf16, #tpu.memory_space<vmem>>, vector<1x4x16xbf16>
    %52 = vector.shape_cast %51 : vector<1x4x16xbf16> to vector<4x16xbf16>
    %cst_38 = arith.constant dense<0.000000e+00> : vector<128x16xf32>
    %53 = tpu.matmul %50, %52, %cst_38 {dimension_numbers = #tpu.dot_dimension_numbers<[1], [0], [0], [1], [0, 0, 1, 1], [], []>} : vector<128x4xbf16>, vector<4x16xbf16>, vector<128x16xf32> -> vector<128x16xf32>
    %54 = arith.addf %45, %53 : vector<128x16xf32>
    %c2_i32 = arith.constant 2 : i32
    %55 = arith.addi %1, %c2_i32 : i32
    %c0_39 = arith.constant 0 : index
    %56 = arith.index_cast %55 : i32 to index
    %c0_40 = arith.constant 0 : index
    %c0_41 = arith.constant 0 : index
    %57 = vector.load %arg2[%c0_39, %56, %c0_40, %c0_41] : memref<1x18x18x4xbf16, #tpu.memory_space<vmem>>, vector<1x8x16x4xbf16>
    %58 = vector.shape_cast %57 : vector<1x8x16x4xbf16> to vector<8x16x4xbf16>
    %59 = vector.shape_cast %58 : vector<8x16x4xbf16> to vector<128x4xbf16>
    %c6 = arith.constant 6 : index
    %c0_42 = arith.constant 0 : index
    %c0_43 = arith.constant 0 : index
    %60 = vector.load %arg3[%c6, %c0_42, %c0_43] : memref<9x4x16xbf16, #tpu.memory_space<vmem>>, vector<1x4x16xbf16>
    %61 = vector.shape_cast %60 : vector<1x4x16xbf16> to vector<4x16xbf16>
    %cst_44 = arith.constant dense<0.000000e+00> : vector<128x16xf32>
    %62 = tpu.matmul %59, %61, %cst_44 {dimension_numbers = #tpu.dot_dimension_numbers<[1], [0], [0], [1], [0, 0, 1, 1], [], []>} : vector<128x4xbf16>, vector<4x16xbf16>, vector<128x16xf32> -> vector<128x16xf32>
    %63 = arith.addf %54, %62 : vector<128x16xf32>
    %c2_i32_45 = arith.constant 2 : i32
    %64 = arith.addi %1, %c2_i32_45 : i32
    %c0_46 = arith.constant 0 : index
    %65 = arith.index_cast %64 : i32 to index
    %c1_47 = arith.constant 1 : index
    %c0_48 = arith.constant 0 : index
    %66 = vector.load %arg2[%c0_46, %65, %c1_47, %c0_48] : memref<1x18x18x4xbf16, #tpu.memory_space<vmem>>, vector<1x8x16x4xbf16>
    %67 = vector.shape_cast %66 : vector<1x8x16x4xbf16> to vector<8x16x4xbf16>
    %68 = vector.shape_cast %67 : vector<8x16x4xbf16> to vector<128x4xbf16>
    %c7 = arith.constant 7 : index
    %c0_49 = arith.constant 0 : index
    %c0_50 = arith.constant 0 : index
    %69 = vector.load %arg3[%c7, %c0_49, %c0_50] : memref<9x4x16xbf16, #tpu.memory_space<vmem>>, vector<1x4x16xbf16>
    %70 = vector.shape_cast %69 : vector<1x4x16xbf16> to vector<4x16xbf16>
    %cst_51 = arith.constant dense<0.000000e+00> : vector<128x16xf32>
    %71 = tpu.matmul %68, %70, %cst_51 {dimension_numbers = #tpu.dot_dimension_numbers<[1], [0], [0], [1], [0, 0, 1, 1], [], []>} : vector<128x4xbf16>, vector<4x16xbf16>, vector<128x16xf32> -> vector<128x16xf32>
    %72 = arith.addf %63, %71 : vector<128x16xf32>
    %c2_i32_52 = arith.constant 2 : i32
    %73 = arith.addi %1, %c2_i32_52 : i32
    %c0_53 = arith.constant 0 : index
    %74 = arith.index_cast %73 : i32 to index
    %c2_54 = arith.constant 2 : index
    %c0_55 = arith.constant 0 : index
    %75 = vector.load %arg2[%c0_53, %74, %c2_54, %c0_55] : memref<1x18x18x4xbf16, #tpu.memory_space<vmem>>, vector<1x8x16x4xbf16>
    %76 = vector.shape_cast %75 : vector<1x8x16x4xbf16> to vector<8x16x4xbf16>
    %77 = vector.shape_cast %76 : vector<8x16x4xbf16> to vector<128x4xbf16>
    %c8 = arith.constant 8 : index
    %c0_56 = arith.constant 0 : index
    %c0_57 = arith.constant 0 : index
    %78 = vector.load %arg3[%c8, %c0_56, %c0_57] : memref<9x4x16xbf16, #tpu.memory_space<vmem>>, vector<1x4x16xbf16>
    %79 = vector.shape_cast %78 : vector<1x4x16xbf16> to vector<4x16xbf16>
    %cst_58 = arith.constant dense<0.000000e+00> : vector<128x16xf32>
    %80 = tpu.matmul %77, %79, %cst_58 {dimension_numbers = #tpu.dot_dimension_numbers<[1], [0], [0], [1], [0, 0, 1, 1], [], []>} : vector<128x4xbf16>, vector<4x16xbf16>, vector<128x16xf32> -> vector<128x16xf32>
    %81 = arith.addf %72, %80 : vector<128x16xf32>
    %c0_59 = arith.constant 0 : index
    %c0_60 = arith.constant 0 : index
    %82 = vector.load %arg4[%c0_59, %c0_60] : memref<1x16xf32, #tpu.memory_space<vmem>>, vector<1x16xf32>
    %83 = vector.broadcast %82 : vector<1x16xf32> to vector<128x16xf32>
    %84 = arith.addf %81, %83 : vector<128x16xf32>
    %85 = vector.shape_cast %84 : vector<128x16xf32> to vector<8x16x16xf32>
    %c0_61 = arith.constant 0 : index
    %c0_62 = arith.constant 0 : index
    %c0_63 = arith.constant 0 : index
    %c0_64 = arith.constant 0 : index
    %86 = vector.load %arg5[%c0_61, %c0_62, %c0_63, %c0_64] : memref<1x8x16x16xf32, #tpu.memory_space<vmem>>, vector<1x8x16x16xf32>
    %87 = vector.shape_cast %86 : vector<1x8x16x16xf32> to vector<8x16x16xf32>
    %88 = vector.shape_cast %85 : vector<8x16x16xf32> to vector<1x8x16x16xf32>
    tpu.vector_store %arg5[%c0_61, %c0_62, %c0_63, %c0_64], %88 {strides = array<i32>} : memref<1x8x16x16xf32, #tpu.memory_space<vmem>>, vector<1x8x16x16xf32>,
    return
  }
  func.func @transform_0(%arg0: i32, %arg1: i32) -> (i32, i32, i32, i32) {
    %c0_i32 = arith.constant 0 : i32
    %c0_i32_0 = arith.constant 0 : i32
    %c0_i32_1 = arith.constant 0 : i32
    %c0_i32_2 = arith.constant 0 : i32
    return %arg0, %c0_i32, %c0_i32_0, %c0_i32_1 : i32, i32, i32, i32
  }
  func.func @transform_1(%arg0: i32, %arg1: i32) -> (i32, i32, i32) {
    %c0_i32 = arith.constant 0 : i32
    %c0_i32_0 = arith.constant 0 : i32
    %c0_i32_1 = arith.constant 0 : i32
    %c0_i32_2 = arith.constant 0 : i32
    return %c0_i32, %c0_i32_0, %c0_i32_1 : i32, i32, i32
  }
  func.func @transform_2(%arg0: i32, %arg1: i32) -> (i32, i32) {
    %c0_i32 = arith.constant 0 : i32
    %c0_i32_0 = arith.constant 0 : i32
    %c0_i32_1 = arith.constant 0 : i32
    return %c0_i32, %c0_i32_0 : i32, i32
  }
  func.func @transform_3(%arg0: i32, %arg1: i32) -> (i32, i32, i32, i32) {
    %c0_i32 = arith.constant 0 : i32
    %c0_i32_0 = arith.constant 0 : i32
    %c0_i32_1 = arith.constant 0 : i32
    return %arg0, %arg1, %c0_i32, %c0_i32_0 : i32, i32, i32, i32
  }
}

</mosaic_0001>

<bundles_post_ra>
// kernel: tpu_custom_call.1
= control target key start
LH: loop header
LB: loop body
LE: loop exit
PB: predicated region body
PF: predicated region fallthrough
CT: control target
= control target key end

     0   :  { %8 = vsyncpa [#allocation3], 0  ;;  %s3815_s0 = inlined_call_operand.vmem [shape: bf16[2,18,18,4], index: 0, kind: input, shape index: {}]   ;;  %s3816_s1 = inlined_call_operand.vmem [shape: bf16[9,4,16], index: 1, kind: input, shape index: {}]   ;;  %s3817_s2 = inlined_call_operand.vmem [shape: f32[1,16], index: 2, kind: input, shape index: {}]   ;;  %s3818_s3 = inlined_call_operand.hbm [shape: f32[2,16,16,16], index: 3, kind: output, shape index: {}]  }
   0x1   :  { %10 = vsyncpa [#allocation3 + $0x1], 0  ;;  %s2899_s12 = smov 0   ;;  %s2901_s13 = smov 0  }
   0x2   :  { %s2903_s14 = smov 0   ;;  %s2905_s15 = smov 0  }
   0x3   :  { %s2907_s16 = smov 0   ;;  %s2909_s17 = smov 0  }
   0x4   :  { %s2911_s18 = smov 0   ;;  %s2913_s19 = smov 0  }
   0x5 LB: > { %s2360_s20 = sadd.s32 4294967295, %s2875_s19   ;;  %s2361_s21 = sadd.s32 4294967294, %s2875_s19   ;;  %s2875_s19 = sphi %s2913_s19, %s16_s19   ;;  %s2871_s18 = sphi %s2911_s18, %s3831_s18   ;;  %s2867_s17 = sphi %s2909_s17, %s3830_s17   ;;  %s2863_s16 = sphi %s2907_s16, %s3829_s16   ;;  %s2859_s15 = sphi %s2905_s15, %s3828_s15   ;;  %s2855_s14 = sphi %s2903_s14, %s3827_s14   ;;  %s2851_s13 = sphi %s2901_s13, %s3826_s13   ;;  %s2847_s12 = sphi %s2899_s12, %s3825_s12  }
   0x6   : > { %s25_s22 = sadd.s32 1, %s2867_s17  ;;  %s28_s23 = sadd.s32 1, %s2871_s18 }
   0x7   : > { %p26_p0 = scmp.ge.s32.totalorder %s25_s22, 2  ;;  %p115_p1 = scmp.ne.s32.totalorder %s2855_s14, %s2851_s13 }
   0x8   : > { %p116_p2 = scmp.eq.s32.totalorder %s2360_s20, 3  ;;  %p121_p5 = scmp.ne.s32.totalorder %s2851_s13, %s2847_s12 }
   0x9   : > { %s3833_s22 = smov (%p26_p0, %s25_s22), 0  ;;  %s3835_s23 = smov (!%p26_p0, %s28_s23), %s2871_s18 }
   0xa   : > { %s101_s24 = ssub.s32 %s2867_s17, %s3833_s22  ;;  %p2950_p3 = por %p116_p2, %p115_p1 }
   0xb   : > { %p30_p4 = scmp.ge.s32.totalorder %s3835_s23, 2  ;;  %p122_p6 = scmp.eq.s32.totalorder %s2361_s21, 3 }
   0xc   : > { %p2364_p7 = scmp.ge.s32.totalorder %s2875_s19, 1  ;;  %p154_p9 = scmp.lt.s32.totalorder %s2875_s19, 5 }
   0xd   : > { %s3837_s23 = smov (%p30_p4, %s3835_s23), 0  ;;  %p2959_p8 = por %p122_p6, %p121_p5 }
   0xe   : > { %s100_s27 = ssub.s32 %s2871_s18, %s3837_s23  ;;  %s105_s28 = sadd.s32 1, %s2855_s14 }
   0xf   : > { %s102_s29 = sor.u32 %s101_s24, %s100_s27  ;;  %p155_p10 = pnand %p2364_p7, %p154_p9 }
  0x10   : > { %p103_p11 = scmp.eq.s32.totalorder %s102_s29, 0  ;;  %p178_p12 = scmp.lt.s32.totalorder (!%p155_p10), %s2863_s16, 1 }
  0x11   : > { %158 = sbr.rel (%p155_p10) target bundleno = 476 (0x1dc), region = 32  ;;  %s175_s27 = sand.u32 (!%p155_p10), 1, %s2851_s13  }
  0x12   : > { %s2968_s30 = scalar_select %p103_p11, %s2855_s14, %s105_s28  }
  0x13   : > { %s2677_s9 = smul.u32 (!%p155_p10), 96, %s2859_s15  ;;  %s2365_s28 = sshll.u32 (!%p155_p10), %s175_s27, 7 }
  0x14   : > { %s2673_s7 = sshll.u32 (!%p155_p10), %s2863_s16, 5  ;;  %s2256_s21 = scalar_lea.sflag (!%p155_p10), [#allocation3], %s175_s27 }
  0x16   : > { %v2370_v0 = vld [vmem:[%s3816_s1 + $0x2] sm:$0x3]  ;;  %vm460_vm0 = vcmask 1041408   ;;  %s179_s6 = scalar_select %p178_p12, %s2863_s16, 1  ;;  %v2427_v2 = vld [vmem:[%s3816_s1 + $0x4] sm:$0x3] }
  0x17   : > { %v462_v1 = vsel %vm460_vm0, %v2370_v0, 0  ;;  %v763_v3 = vsel %vm460_vm0, %v2427_v2, 0  ;;  %v2454_v4 = vld [vmem:[%s3816_s1 + $0x6] sm:$0x3]  ;;  %v205_v5 = vld [vmem:[%s3816_s1] sm:$0x3] }
  0x18   : > { %2703 = vmatpush.bf16.msra.mxu1 %v462_v1  ;;  %2704 = vmatpush.bf16.msra.mxu2 %v462_v1  ;;  %s2706_s10 = smul.u32 216, %s179_s6  ;;  %v917_v6 = vsel %vm460_vm0, %v2454_v4, 0  ;;  %v578_v7 = vsel %vm460_vm0, %v205_v5, 0  ;;  %v2519_v8 = vld [vmem:[%s3816_s1 + $0x8] sm:$0x3]  ;;  %vm435_vm3 = vcmask 31744  }
  0x19   : > { %2705 = vmatpush.bf16.msra.mxu3 %v462_v1  ;;  %471 = vmatpush.bf16.msra.mxu0 %v462_v1  ;;  %v1251_v9 = vsel %vm460_vm0, %v2519_v8, 0  ;;  %vm214_vm1 = vsmask.f32 3328  ;;  %vm215_vm2 = vsmask.f32 7440  ;;  %vm653_vm5 = vcmask 1042432  }
  0x1a   : > { %s182_s5 = scalar_lea.vmem %s3815_s0, %s2706_s10  ;;  %vm3024_vm4 = vmor %vm214_vm1, %vm215_vm2  ;;  %vm654_vm6 = vcmask 1046532   ;;  %vm2238_vm8 = vcmask 130048  }
  0x1b   : > { %s2996_s6 = scalar_lea.vmem %s182_s5, %s2677_s9  ;;  %vm3132_vm7 = vmor %vm653_vm5, %vm654_vm6  ;;  %s3706_s5 = scalar_lea.vmem [#allocation2], %s2365_s28 }
  0x1c   : > { %772 = vmatpush.bf16.msrb.mxu2 %v763_v3  ;;  %587 = vmatpush.bf16.msrb.mxu1 %v578_v7  ;;  %v193_v10 = vld [vmem:[%s2996_s6 + $0x18] sm:$0xf]  ;;  %v3000_v11 = vld [vmem:[%s2996_s6 + $0x1c] sm:$0xf]  ;;  %v3003_v12 = vld [vmem:[%s2996_s6 + $0x20] sm:$0x1] }
  0x1d   : > { %926 = vmatpush.bf16.msrb.mxu3 %v917_v6  ;;  %1260 = vmatpush.bf16.msrb.mxu0 %v1251_v9  ;;  %v266_v13 = vshrl.u32 %v193_v10, 16  ;;  %v269_v14 = vshll.u32 %v193_v10, 16  ;;  %v275_v15 = vshll.u32 %v3000_v11, 16  ;;  %v279_v16 = vshrl.u32 %v3000_v11, 16  ;;  %v197_v17 = vld [vmem:[%s2996_s6 + $0x30] sm:$0xf] }
  0x1e   : > { %v285_v18 = vshll.u32 %v3003_v12, 16  ;;  %v3010_v19 = vld [vmem:[%s2996_s6 + $0x34] sm:$0xf]  ;;  %v3013_v20 = vld [vmem:[%s2996_s6 + $0x38] sm:$0x1]  ;;  %v314_v21 = vshrl.u32 %v197_v17, 16 }
  0x1f   : > { %v268_v22 = vrot.slane %v266_v13, 4  ;;  %v271_v23 = vrot.slane %v269_v14, 5  ;;  %v277_v24 = vrot.slane %v275_v15, 5  ;;  %v281_v25 = vrot.slane %v279_v16, 4  ;;  %v201_v26 = vld [vmem:[%s2996_s6 + $0x48] sm:$0xf] }
  0x20   : > { %v287_v27 = vrot.slane %v285_v18, 5  ;;  %v316_v28 = vrot.slane %v314_v21, 4  ;;  %v317_v29 = vshll.u32 %v197_v17, 16  ;;  %v323_v30 = vshll.u32 %v3010_v19, 16  ;;  %v3020_v35 = vld [vmem:[%s2996_s6 + $0x4c] sm:$0xf] }
  0x21   : > { %v272_v31 = vor.u32 %v271_v23, %v268_v22  ;;  %v282_v32 = vor.u32 %v281_v25, %v277_v24  ;;  %v327_v33 = vshrl.u32 %v3010_v19, 16  ;;  %v333_v34 = vshll.u32 %v3013_v20, 16  ;;  %v3029_v46 = vld [vmem:[%s2996_s6 + $0x50] sm:$0x1]  ;;  %v189_v54 = vld [vmem:[%s2996_s6] sm:$0xf] }
  0x22   : > { %v319_v37 = vrot.slane %v317_v29, 5  ;;  %v325_v38 = vrot.slane %v323_v30, 5  ;;  %v362_v39 = vshrl.u32 %v201_v26, 16  ;;  %v365_v40 = vshll.u32 %v201_v26, 16  ;;  %v3042_v2 = vld [vmem:[%s2996_s6 + $0x4] sm:$0xf] }
  0x23   : > { %v273_v41 = vrot.slane %v272_v31, 4  ;;  %v283_v42 = vrot.slane %v282_v32, 4  ;;  %v329_v43 = vrot.slane %v327_v33, 4  ;;  %v335_v44 = vrot.slane %v333_v34, 5  ;;  %v3047_v8 = vld [vmem:[%s2996_s6 + $0x8] sm:$0x1] }
  0x24   : > { %v320_v45 = vor.u32 %v319_v37, %v316_v28  ;;  %v364_v47 = vrot.slane %v362_v39, 4  ;;  %v367_v48 = vrot.slane %v365_v40, 5  ;;  %v371_v49 = vshll.u32 %v3020_v35, 16  ;;  %v195_v15 = vld [vmem:[%s2996_s6 + $0x24] sm:$0xf]  ;;  %s2271_s11 = sshll.u32 %s3706_s5, 4  ;;  %s2272_s11 = int_to_ptr.vmem [resolvable:$true] %s2271_s11 }
  0x25   : > { %v278_v50 = vsel %vm3024_vm4, %v273_v41, %v277_v24  ;;  %v288_v51 = vsel %vm3024_vm4, %v283_v42, %v287_v27  ;;  %v330_v52 = vor.u32 %v329_v43, %v325_v38  ;;  %v375_v53 = vshrl.u32 %v3020_v35, 16  ;;  %v3058_v26 = vld [vmem:[%s2996_s6 + $0x28] sm:$0xf]  ;;  %v3063_v30 = vld [vmem:[%s2996_s6 + $0x2c] sm:$0x1] }
  0x26   : > { %v415_v55 = vunpack.c.l.b16 %v278_v50  ;;  %v416_v56 = vunpack.c.l.b16 %v288_v51  ;;  %v321_v57 = vrot.slane %v320_v45, 4  ;;  %v368_v58 = vor.u32 %v367_v48, %v364_v47  ;;  %v3071_v51 = vld [vmem:[%s2996_s6 + $0x40] sm:$0xf] }
  0x27   : > { %v331_v59 = vrot.slane %v330_v52, 4  ;;  %v373_v60 = vrot.slane %v371_v49, 5  ;;  %v377_v61 = vrot.slane %v375_v53, 4  ;;  %v381_v62 = vshll.u32 %v3029_v46, 16 }
  0x28   : > { %v429_v63 = vpack.c.b16 %v416_v56, %v415_v55  ;;  %v326_v0 = vsel %vm3024_vm4, %v321_v57, %v325_v38  ;;  %v369_v1 = vrot.slane %v368_v58, 4  ;;  %v218_v3 = vshrl.u32 %v189_v54, 16  ;;  %v199_v38 = vld [vmem:[%s2996_s6 + $0x3c] sm:$0xf]  ;;  %v3077_v56 = vld [vmem:[%s2996_s6 + $0x44] sm:$0x1] }
  0x29   : > { %v336_v4 = vsel %vm3024_vm4, %v331_v59, %v335_v44  ;;  %v419_v5 = vunpack.c.l.b16 %v326_v0  ;;  %v378_v6 = vor.u32 %v377_v61, %v373_v60  ;;  %v383_v7 = vrot.slane %v381_v62, 5  ;;  %v203_v58 = vld [vmem:[%s2996_s6 + $0x54] sm:$0xf] }
  0x2a   : > { %2373 = vmatmul.msk.bf16.vlgmr.msra.gmra.mxu1 %vm435_vm3, %v429_v63  ;;  %v420_v9 = vunpack.c.l.b16 %v336_v4  ;;  %v374_v10 = vsel %vm3024_vm4, %v369_v1, %v373_v60  ;;  %v220_v13 = vrot.slane %v218_v3, 4  ;;  %v221_v14 = vshll.u32 %v189_v54, 16 }
  0x2b   : > { %v379_v16 = vrot.slane %v378_v6, 4  ;;  %v423_v17 = vunpack.c.l.b16 %v374_v10  ;;  %v227_v18 = vshll.u32 %v3042_v2, 16  ;;  %v231_v21 = vshrl.u32 %v3042_v2, 16 }
  0x2c   : > { %v431_v22 = vpack.c.b16 %v420_v9, %v419_v5  ;;  %v223_v23 = vrot.slane %v221_v14, 5  ;;  %v237_v24 = vshll.u32 %v3047_v8, 16  ;;  %v661_v25 = vrot.slane %v3047_v8, 5 }
  0x2d   : > { %v384_v27 = vsel %vm3024_vm4, %v379_v16, %v383_v7  ;;  %v229_v28 = vrot.slane %v227_v18, 5  ;;  %v233_v29 = vrot.slane %v231_v21, 4  ;;  %v290_v31 = vshrl.u32 %v195_v15, 16  ;;  %v3091_v16 = vld [vmem:[%s2996_s6 + $0x5c] sm:$0x1] }
  0x2e   : > { %2375 = vmatmul.msk.bf16.vlgmr.msra.gmra.mxu2 %vm435_vm3, %v431_v22  ;;  %v424_v32 = vunpack.c.l.b16 %v384_v27  ;;  %v224_v33 = vor.u32 %v223_v23, %v220_v13  ;;  %v239_v34 = vrot.slane %v237_v24, 5  ;;  %v293_v37 = vshll.u32 %v195_v15, 16  ;;  %v3088_v15 = vld [vmem:[%s2996_s6 + $0x58] sm:$0xf]  ;;  %v191_v23 = vld [vmem:[%s2996_s6 + $0xc] sm:$0xf] }
  0x2f   : > { %v234_v39 = vor.u32 %v233_v29, %v229_v28  ;;  %v292_v40 = vrot.slane %v290_v31, 4  ;;  %v299_v41 = vshll.u32 %v3058_v26, 16  ;;  %v303_v42 = vshrl.u32 %v3058_v26, 16 }
  0x30   : > { %v433_v43 = vpack.c.b16 %v424_v32, %v423_v17  ;;  %v225_v44 = vrot.slane %v224_v33, 4  ;;  %v295_v45 = vrot.slane %v293_v37, 5  ;;  %v309_v47 = vshll.u32 %v3063_v30, 16 }
  0x31   : > { %v235_v48 = vrot.slane %v234_v39, 4  ;;  %v301_v49 = vrot.slane %v299_v41, 5  ;;  %v305_v50 = vrot.slane %v303_v42, 4  ;;  %v338_v52 = vshrl.u32 %v199_v38, 16 }
  0x32   : > { %2377 = vmatmul.msk.bf16.vlgmr.msra.gmra.mxu3 %vm435_vm3, %v433_v43  ;;  %v230_v53 = vsel %vm3024_vm4, %v225_v44, %v229_v28  ;;  %v296_v54 = vor.u32 %v295_v45, %v292_v40  ;;  %v311_v55 = vrot.slane %v309_v47, 5  ;;  %v341_v57 = vshll.u32 %v199_v38, 16  ;;  %v3103_v40 = vld [vmem:[%s2996_s6 + $0x10] sm:$0xf]  ;;  %v3106_v47 = vld [vmem:[%s2996_s6 + $0x14] sm:$0x1] }
  0x33   : > { %v240_v59 = vsel %vm3024_vm4, %v235_v48, %v239_v34  ;;  %v411_v60 = vunpack.c.l.b16 %v230_v53  ;;  %v306_v61 = vor.u32 %v305_v50, %v301_v49  ;;  %v340_v62 = vrot.slane %v338_v52, 4 }
  0x34   : > { %v412_v63 = vunpack.c.l.b16 %v240_v59  ;;  %v297_v0 = vrot.slane %v296_v54, 4  ;;  %v343_v1 = vrot.slane %v341_v57, 5  ;;  %v347_v3 = vshll.u32 %v3071_v51, 16 }
  0x35   : > { %v307_v4 = vrot.slane %v306_v61, 4  ;;  %v351_v5 = vshrl.u32 %v3071_v51, 16  ;;  %v357_v6 = vshll.u32 %v3077_v56, 16  ;;  %v386_v7 = vshrl.u32 %v203_v58, 16 }
  0x36   : > { %v427_v9 = vpack.c.b16 %v412_v63, %v411_v60  ;;  %v302_v10 = vsel %vm3024_vm4, %v297_v0, %v301_v49  ;;  %v344_v13 = vor.u32 %v343_v1, %v340_v62  ;;  %v349_v14 = vrot.slane %v347_v3, 5  ;;  %v629_v1 = vld [vmem:[%s2996_s6] sm:$0xe] }
  0x37   : > { %v312_v17 = vsel %vm3024_vm4, %v307_v4, %v311_v55  ;;  %v417_v18 = vunpack.c.l.b16 %v302_v10  ;;  %v353_v21 = vrot.slane %v351_v5, 4  ;;  %v359_v22 = vrot.slane %v357_v6, 5 }
  0x38   : > { %2371 = vmatmul.msk.bf16.vlgmr.msra.gmra.mxu0 %vm435_vm3, %v427_v9  ;;  %v418_v24 = vunpack.c.l.b16 %v312_v17  ;;  %v345_v27 = vrot.slane %v344_v13, 4  ;;  %v388_v28 = vrot.slane %v386_v7, 4  ;;  %v389_v29 = vshll.u32 %v203_v58, 16  ;;  %v2571_v7 = vld [vmem:[%s3816_s1 + $0xc] sm:$0x3] }
  0x39   : > { %v354_v31 = vor.u32 %v353_v21, %v349_v14  ;;  %v395_v32 = vshll.u32 %v3088_v15, 16  ;;  %v399_v33 = vshrl.u32 %v3088_v15, 16  ;;  %v405_v34 = vshll.u32 %v3091_v16, 16  ;;  %v2495_v9 = vld [vmem:[%s2996_s6 + $0xc] sm:$0xf] }
  0x3a   : > { %v430_v37 = vpack.c.b16 %v418_v24, %v417_v18  ;;  %v350_v38 = vsel %vm3024_vm4, %v345_v27, %v349_v14  ;;  %v391_v39 = vrot.slane %v389_v29, 5  ;;  %v242_v41 = vshrl.u32 %v191_v23, 16  ;;  %v3127_v27 = vld [vmem:[%s2996_s6 + $0x10] sm:$0xf] }
  0x3b   : > { %v355_v42 = vrot.slane %v354_v31, 4  ;;  %v421_v43 = vunpack.c.l.b16 %v350_v38  ;;  %v397_v44 = vrot.slane %v395_v32, 5  ;;  %v401_v45 = vrot.slane %v399_v33, 4 }
  0x3c   : > { %2374 = vmatmul.msk.bf16.gmra.mxu1 %vm435_vm3, %v430_v37  ;;  %v392_v48 = vor.u32 %v391_v39, %v388_v28  ;;  %v407_v49 = vrot.slane %v405_v34, 5  ;;  %v244_v50 = vrot.slane %v242_v41, 4  ;;  %v245_v52 = vshll.u32 %v191_v23, 16  ;;  %v3137_v37 = vld [vmem:[%s2996_s6 + $0x14] sm:$0x1] }
  0x3d   : > { %v360_v53 = vsel %vm3024_vm4, %v355_v42, %v359_v22  ;;  %v402_v54 = vor.u32 %v401_v45, %v397_v44  ;;  %v251_v55 = vshll.u32 %v3103_v40, 16  ;;  %v255_v57 = vshrl.u32 %v3103_v40, 16  ;;  %v2636_v41 = vld [vmem:[%s3816_s1 + $0xe] sm:$0x3]  ;;  %v2544_v45 = vld [vmem:[%s3816_s1 + $0xa] sm:$0x3] }
  0x3e   : > { %v422_v58 = vunpack.c.l.b16 %v360_v53  ;;  %v393_v59 = vrot.slane %v392_v48, 4  ;;  %v247_v60 = vrot.slane %v245_v52, 5  ;;  %v261_v61 = vshll.u32 %v3106_v47, 16  ;;  %v2661_v53 = vld [vmem:[%s3816_s1 + $0x10] sm:$0x3] }
  0x3f   : > { %v403_v62 = vrot.slane %v402_v54, 4  ;;  %v253_v63 = vrot.slane %v251_v55, 5  ;;  %v257_v0 = vrot.slane %v255_v57, 4  ;;  %v2419_v21 = vrot.slane %v629_v1, 9  ;;  %v2678_v55 = vld [vmem:[%s2996_s6] sm:$0xff] }
  0x40   : > { %v432_v3 = vpack.c.b16 %v422_v58, %v421_v43  ;;  %v398_v4 = vsel %vm3024_vm4, %v393_v59, %v397_v44  ;;  %v248_v5 = vor.u32 %v247_v60, %v244_v50  ;;  %v263_v6 = vrot.slane %v261_v61, 5 }
  0x41   : > { %v408_v10 = vsel %vm3024_vm4, %v403_v62, %v407_v49  ;;  %v425_v13 = vunpack.c.l.b16 %v398_v4  ;;  %v258_v14 = vor.u32 %v257_v0, %v253_v63  ;;  %v658_v22 = vrot.slane %v3042_v2, 5  ;;  %v3168_v4 = vld [vmem:[%s2996_s6 + $0x1c] sm:$0xf] }
  0x42   : > { %2376 = vmatmul.msk.bf16.gmra.mxu2 %vm435_vm3, %v432_v3  ;;  %v426_v17 = vunpack.c.l.b16 %v408_v10  ;;  %v249_v18 = vrot.slane %v248_v5, 4  ;;  %v1611_v24 = vsel %vm460_vm0, %v2571_v7, 0  ;;  %v1009_v28 = vshrl.u32 %v2495_v9, 16  ;;  %v2498_v3 = vld [vmem:[%s2996_s6 + $0x18] sm:$0xf] }
  0x43   : > { %v259_v23 = vrot.slane %v258_v14, 4  ;;  %v1012_v29 = vshll.u32 %v2495_v9, 16  ;;  %v660_v34 = vrot.slane %v658_v22, 4  ;;  %1620 = vmatpush.bf16.msra.mxu2 %v1611_v24  ;;  %v1018_v44 = vshll.u32 %v3127_v27, 16  ;;  %v631_v5 = vld [vmem:[%s2996_s6 + $0x18] sm:$0xe] }
  0x44   : > { %v434_v31 = vpack.c.b16 %v426_v17, %v425_v13  ;;  %v254_v32 = vsel %vm3024_vm4, %v249_v18, %v253_v63  ;;  %v1011_v39 = vrot.slane %v1009_v28, 4  ;;  %v659_v48 = vsel %vm3132_vm7, %v2419_v21, %v658_v22  ;;  %v630_v7 = vld [vmem:[%s2996_s6 + $0xc] sm:$0xe] }
  0x45   : > { %v264_v2 = vsel %vm3024_vm4, %v259_v23, %v263_v6  ;;  %v413_v38 = vunpack.c.l.b16 %v254_v32  ;;  %v1014_v43 = vrot.slane %v1012_v29, 5  ;;  %v662_v49 = vsel %vm3132_vm7, %v660_v34, %v661_v25  ;;  %v2686_v34 = vld [vmem:[%s2996_s6 + $0xc] sm:$0xff] }
  0x46   : > { %2378 = vmatmul.msk.bf16.gmra.mxu3 %vm435_vm3, %v434_v31  ;;  %v414_v42 = vunpack.c.l.b16 %v264_v2  ;;  %v1022_v50 = vshrl.u32 %v3127_v27, 16  ;;  %v1028_v52 = vshll.u32 %v3137_v37, 16  ;;  %v1020_v58 = vrot.slane %v1018_v44, 5 }
  0x47   : > { %v1015_v57 = vor.u32 %v1014_v43, %v1011_v39  ;;  %v1945_v59 = vsel %vm460_vm0, %v2636_v41, 0  ;;  %v1457_v25 = vsel %vm460_vm0, %v2544_v45, 0  ;;  %v714_v60 = vunpack.c.l.b16 %v659_v48 }
  0x48   : > { %v428_v54 = vpack.c.b16 %v414_v42, %v413_v38  ;;  %v1024_v8 = vrot.slane %v1022_v50, 4  ;;  %1954 = vmatpush.bf16.msra.mxu3 %v1945_v59  ;;  %v715_v61 = vunpack.c.l.b16 %v662_v49  ;;  %1466 = vmatpush.bf16.msra.mxu1 %v1457_v25  ;;  %v2151_v63 = vsel %vm460_vm0, %v2661_v53, 0 }
  0x49   : > { %v1016_v62 = vrot.slane %v1015_v57, 4  ;;  %v1030_v1 = vrot.slane %v1028_v52, 5  ;;  %2160 = vmatpush.bf16.msra.mxu0 %v2151_v63  ;;  %v665_v9 = vrot.slane %v3103_v40, 5  ;;  %v1033_v14 = vshrl.u32 %v2498_v3, 16  ;;  %v632_v63 = vld [vmem:[%s2996_s6 + $0x24] sm:$0xe] }
  0x4a   : > { %2372 = vmatmul.msk.bf16.gmra.mxu0 %vm435_vm3, %v428_v54  ;;  %v1025_v0 = vor.u32 %v1024_v8, %v1020_v58  ;;  %v730_v10 = vpack.c.b16 %v715_v61, %v714_v60  ;;  %v1036_v17 = vshll.u32 %v2498_v3, 16  ;;  %v1042_v21 = vshll.u32 %v3168_v4, 16  ;;  %v2501_v61 = vld [vmem:[%s2996_s6 + $0x24] sm:$0xf] }
  0x4b   : > { %v1021_v13 = vsel %vm3024_vm4, %v1016_v62, %v1020_v58  ;;  %v1046_v22 = vshrl.u32 %v3168_v4, 16  ;;  %v2421_v23 = vrot.slane %v631_v5, 9  ;;  %v2420_v24 = vrot.slane %v630_v7, 9  ;;  %v3202_v62 = vld [vmem:[%s2996_s6 + $0x28] sm:$0xf] }
  0x4c   : > { %2411 = vmatmul.msk.bf16.vlgmr.msrb.gmra.mxu1 %vm435_vm3, %v2678_v55  ;;  %v1026_v6 = vrot.slane %v1025_v0, 4  ;;  %v672_v28 = vrot.slane %v3000_v11, 5  ;;  %v1202_v40 = vunpack.c.l.b16 %v1021_v13  ;;  %v667_v29 = vrot.slane %v665_v9, 4  ;;  %v3187_v11 = vld [vmem:[%s2996_s6 + $0x20] sm:$0x1]  ;;  %v2679_v55 = vld [vmem:[%s2996_s6 + $0xc] sm:$0xff] }
  0x4d   : > { %v668_v31 = vrot.slane %v3106_v47, 5  ;;  %v675_v32 = vrot.slane %v3003_v12, 5  ;;  %v1035_v38 = vrot.slane %v1033_v14, 4  ;;  %v1038_v39 = vrot.slane %v1036_v17, 5 }
  0x4e   : > { %v1031_v18 = vsel %vm3024_vm4, %v1026_v6, %v1030_v1  ;;  %v673_v41 = vsel %vm3132_vm7, %v2421_v23, %v672_v28  ;;  %v1044_v42 = vrot.slane %v1042_v21, 5  ;;  %v1048_v43 = vrot.slane %v1046_v22, 4  ;;  %v2687_v22 = vld [vmem:[%s2996_s6 + $0x18] sm:$0xff] }
  0x4f   : > { %v1203_v2 = vunpack.c.l.b16 %v1031_v18  ;;  %v674_v44 = vrot.slane %v672_v28, 4  ;;  %v718_v45 = vunpack.c.l.b16 %v673_v41  ;;  %v666_v47 = vsel %vm3132_vm7, %v2420_v24, %v665_v9 }
  0x50   : > { %v669_v49 = vsel %vm3132_vm7, %v667_v29, %v668_v31  ;;  %v1039_v50 = vor.u32 %v1038_v39, %v1035_v38  ;;  %v1049_v53 = vor.u32 %v1048_v43, %v1044_v42  ;;  %v1052_v54 = vshll.u32 %v3187_v11, 16  ;;  %v2504_v43 = vld [vmem:[%s2996_s6 + $0x30] sm:$0xf] }
  0x51   : > { %v676_v12 = vsel %vm3132_vm7, %v674_v44, %v675_v32  ;;  %v1218_v48 = vpack.c.b16 %v1203_v2, %v1202_v40  ;;  %v716_v58 = vunpack.c.l.b16 %v666_v47  ;;  %v717_v59 = vunpack.c.l.b16 %v669_v49  ;;  %v3228_v44 = vld [vmem:[%s2996_s6 + $0x34] sm:$0xf] }
  0x52   : > { %2428 = vmatmul.msk.bf16.vlgmr.msrb.gmra.mxu2 %vm435_vm3, %v730_v10  ;;  %v719_v52 = vunpack.c.l.b16 %v676_v12  ;;  %v1040_v8 = vrot.slane %v1039_v50, 4  ;;  %v1050_v25 = vrot.slane %v1049_v53, 4  ;;  %v1054_v60 = vrot.slane %v1052_v54, 5 }
  0x53   : > { %v679_v0 = vrot.slane %v3058_v26, 5  ;;  %v682_v1 = vrot.slane %v3063_v30, 5  ;;  %v731_v3 = vpack.c.b16 %v717_v59, %v716_v58  ;;  %v2422_v5 = vrot.slane %v632_v63, 9  ;;  %v3240_v63 = vld [vmem:[%s2996_s6 + $0x38] sm:$0x1] }
  0x54   : > { %v732_v57 = vpack.c.b16 %v719_v52, %v718_v45  ;;  %v1045_v6 = vsel %vm3024_vm4, %v1040_v8, %v1044_v42  ;;  %v1057_v7 = vshrl.u32 %v2501_v61, 16  ;;  %v1060_v9 = vshll.u32 %v2501_v61, 16  ;;  %v2680_v42 = vld [vmem:[%s2996_s6 + $0x18] sm:$0xff] }
  0x55   : > { %v681_v10 = vrot.slane %v679_v0, 4  ;;  %v1055_v13 = vsel %vm3024_vm4, %v1050_v25, %v1054_v60  ;;  %v1066_v14 = vshll.u32 %v3202_v62, 16  ;;  %v1070_v17 = vshrl.u32 %v3202_v62, 16  ;;  %v2688_v25 = vld [vmem:[%s2996_s6 + $0x24] sm:$0xff] }
  0x56   : > { %2487 = vmatmul.msk.bf16.vlgmr.msrb.gmra.mxu3 %vm435_vm3, %v2686_v34  ;;  %v680_v26 = vsel %vm3132_vm7, %v2422_v5, %v679_v0  ;;  %v1204_v23 = vunpack.c.l.b16 %v1045_v6  ;;  %v1205_v24 = vunpack.c.l.b16 %v1055_v13  ;;  %v1059_v28 = vrot.slane %v1057_v7, 4  ;;  %v3220_v34 = vld [vmem:[%s2996_s6 + $0x2c] sm:$0x1]  ;;  %v2681_v6 = vld [vmem:[%s2996_s6 + $0x24] sm:$0xff]  ;;  %v3248_v13 = vld [vmem:[%s2996_s6 + $0x40] sm:$0xf] }
  0x57   : > { %v683_v30 = vsel %vm3132_vm7, %v681_v10, %v682_v1  ;;  %v720_v18 = vunpack.c.l.b16 %v680_v26  ;;  %v1062_v40 = vrot.slane %v1060_v9, 5  ;;  %v1068_v29 = vrot.slane %v1066_v14, 5  ;;  %v633_v26 = vld [vmem:[%s2996_s6 + $0x30] sm:$0xe] }
  0x58   : > { %v721_v21 = vunpack.c.l.b16 %v683_v30  ;;  %v1072_v31 = vrot.slane %v1070_v17, 4  ;;  %v1219_v2 = vpack.c.b16 %v1205_v24, %v1204_v23  ;;  %v1076_v41 = vshll.u32 %v3220_v34, 16 }
  0x59   : > { %v1063_v38 = vor.u32 %v1062_v40, %v1059_v28  ;;  %v1084_v49 = vshll.u32 %v2504_v43, 16  ;;  %v1090_v50 = vshll.u32 %v3228_v44, 16  ;;  %v1094_v52 = vshrl.u32 %v3228_v44, 16 }
  0x5a   : > { %2520 = vmatmul.msk.bf16.vlgmr.msrb.gmra.mxu0 %vm435_vm3, %v1218_v48  ;;  %v733_v32 = vpack.c.b16 %v721_v21, %v720_v18  ;;  %v1073_v39 = vor.u32 %v1072_v31, %v1068_v29  ;;  %v1078_v12 = vrot.slane %v1076_v41, 5  ;;  %v1081_v48 = vshrl.u32 %v2504_v43, 16  ;;  %v3263_v43 = vld [vmem:[%s2996_s6 + $0x44] sm:$0x1] }
  0x5b   : > { %v1064_v45 = vrot.slane %v1063_v38, 4  ;;  %v1086_v58 = vrot.slane %v1084_v49, 5  ;;  %v1092_v59 = vrot.slane %v1090_v50, 5  ;;  %v1096_v8 = vrot.slane %v1094_v52, 4  ;;  %v2682_v49 = vld [vmem:[%s2996_s6 + $0x30] sm:$0xff] }
  0x5c   : > { %2412 = vmatmul.msk.bf16.gmra.mxu1 %vm435_vm3, %v2679_v55  ;;  %v1074_v47 = vrot.slane %v1073_v39, 4  ;;  %v1083_v55 = vrot.slane %v1081_v48, 4  ;;  %v1114_v21 = vshll.u32 %v3248_v13, 16  ;;  %v686_v23 = vrot.slane %v3010_v19, 5 }
  0x5d   : > { %v1069_v53 = vsel %vm3024_vm4, %v1064_v45, %v1068_v29  ;;  %v1097_v1 = vor.u32 %v1096_v8, %v1092_v59  ;;  %v2423_v40 = vrot.slane %v633_v26, 9  ;;  %v2689_v29 = vld [vmem:[%s2996_s6 + $0x30] sm:$0xff] }
  0x5e   : > { %v1079_v54 = vsel %vm3024_vm4, %v1074_v47, %v1078_v12  ;;  %v1206_v60 = vunpack.c.l.b16 %v1069_v53  ;;  %v1087_v0 = vor.u32 %v1086_v58, %v1083_v55  ;;  %v1116_v38 = vrot.slane %v1114_v21, 5  ;;  %v2510_v55 = vld [vmem:[%s2996_s6 + $0x48] sm:$0xf]  ;;  %v3276_v58 = vld [vmem:[%s2996_s6 + $0x4c] sm:$0xf] }
  0x5f   : > { %v1207_v61 = vunpack.c.l.b16 %v1079_v54  ;;  %v1098_v9 = vrot.slane %v1097_v1, 4  ;;  %v688_v41 = vrot.slane %v686_v23, 4  ;;  %v687_v19 = vsel %vm3132_vm7, %v2423_v40, %v686_v23  ;;  %v2683_v40 = vld [vmem:[%s2996_s6 + $0x3c] sm:$0xff] }
  0x60   : > { %v1088_v7 = vrot.slane %v1087_v0, 4  ;;  %v1124_v12 = vshll.u32 %v3263_v43, 16  ;;  %v1129_v0 = vshrl.u32 %v2510_v55, 16  ;;  %v1132_v1 = vshll.u32 %v2510_v55, 16 }
  0x61   : > { %v1220_v5 = vpack.c.b16 %v1207_v61, %v1206_v60  ;;  %v693_v60 = vrot.slane %v3071_v51, 5  ;;  %v634_v61 = vld [vmem:[%s2996_s6 + $0x3c] sm:$0xe] }
  0x62   : > { %2429 = vmatmul.msk.bf16.gmra.mxu2 %vm435_vm3, %v731_v3  ;;  %v1100_v3 = vshll.u32 %v3240_v63, 16  ;;  %v1093_v14 = vsel %vm3024_vm4, %v1088_v7, %v1092_v59  ;;  %v1126_v54 = vrot.slane %v1124_v12, 5  ;;  %v2690_v7 = vld [vmem:[%s2996_s6 + $0x3c] sm:$0xff]  ;;  %v1134_v51 = vrot.slane %v1132_v1, 5 }
  0x63   : > { %v1208_v24 = vunpack.c.l.b16 %v1093_v14  ;;  %v696_v14 = vrot.slane %v3077_v56, 5  ;;  %v3317_v1 = vld [vmem:[%s2996_s6 + $0x5c] sm:$0x1] }
  0x64   : > { %v1102_v10 = vrot.slane %v1100_v3, 5  ;;  %v1138_v3 = vshll.u32 %v3276_v58, 16 }
  0x66   : > { %2488 = vmatmul.msk.bf16.gmra.mxu3 %vm435_vm3, %v2687_v22  ;;  %v1103_v17 = vsel %vm3024_vm4, %v1098_v9, %v1102_v10  ;;  %v1118_v22 = vshrl.u32 %v3248_v13, 16  ;;  %v2424_v10 = vrot.slane %v634_v61, 9  ;;  %v1140_v26 = vrot.slane %v1138_v3, 5 }
  0x67   : > { %v1209_v28 = vunpack.c.l.b16 %v1103_v17  ;;  %v1131_v17 = vrot.slane %v1129_v0, 4  ;;  %v703_v61 = vrot.slane %v3029_v46, 5  ;;  %v1172_v46 = vshll.u32 %v3317_v1, 16 }
  0x68   : > { %v1120_v39 = vrot.slane %v1118_v22, 4  ;;  %v694_v22 = vsel %vm3132_vm7, %v2424_v10, %v693_v60  ;;  %v2684_v10 = vld [vmem:[%s2996_s6 + $0x48] sm:$0xff] }
  0x69   : > { %v1221_v45 = vpack.c.b16 %v1209_v28, %v1208_v24  ;;  %v1135_v24 = vor.u32 %v1134_v51, %v1131_v17 }
  0x6a   : > { %2521 = vmatmul.msk.bf16.gmra.mxu0 %vm435_vm3, %v1219_v2  ;;  %v1121_v47 = vor.u32 %v1120_v39, %v1116_v38 }
  0x6c   : > { %2413 = vmatmul.msk.bf16.gmra.mxu1 %vm435_vm3, %v2680_v42  ;;  %v689_v42 = vrot.slane %v3013_v20, 5  ;;  %v722_v20 = vunpack.c.l.b16 %v687_v19  ;;  %v1122_v53 = vrot.slane %v1121_v47, 4 }
  0x6e   : > { %v690_v48 = vsel %vm3132_vm7, %v688_v41, %v689_v42  ;;  %v3302_v42 = vld [vmem:[%s2996_s6 + $0x58] sm:$0xf] }
  0x6f   : > { %v723_v50 = vunpack.c.l.b16 %v690_v48  ;;  %v1162_v47 = vshll.u32 %v3302_v42, 16 }
  0x71   : > { %v734_v59 = vpack.c.b16 %v723_v50, %v722_v20  ;;  %v1166_v20 = vshrl.u32 %v3302_v42, 16  ;;  %v635_v50 = vld [vmem:[%s2996_s6 + $0x48] sm:$0xe] }
  0x72   : > { %2430 = vmatmul.msk.bf16.gmra.mxu2 %vm435_vm3, %v732_v57  ;;  %v2507_v57 = vld [vmem:[%s2996_s6 + $0x3c] sm:$0xf] }
  0x73   : > { %v1105_v30 = vshrl.u32 %v2507_v57, 16  ;;  %v1108_v18 = vshll.u32 %v2507_v57, 16  ;;  %v695_v57 = vrot.slane %v693_v60, 4  ;;  %v1168_v0 = vrot.slane %v1166_v20, 4 }
  0x75   : > { %v1107_v31 = vrot.slane %v1105_v30, 4  ;;  %v1110_v2 = vrot.slane %v1108_v18, 5  ;;  %v3290_v18 = vld [vmem:[%s2996_s6 + $0x50] sm:$0x1]  ;;  %v697_v23 = vsel %vm3132_vm7, %v695_v57, %v696_v14 }
  0x76   : > { %2489 = vmatmul.msk.bf16.gmra.mxu3 %vm435_vm3, %v2688_v25  ;;  %v1127_v25 = vsel %vm3024_vm4, %v1122_v53, %v1126_v54  ;;  %v1148_v56 = vshll.u32 %v3290_v18, 16  ;;  %v2691_v54 = vld [vmem:[%s2996_s6 + $0x48] sm:$0xff] }
  0x77   : > { %v1211_v9 = vunpack.c.l.b16 %v1127_v25  ;;  %v2425_v25 = vrot.slane %v635_v50, 9  ;;  %v3350_v50 = vld [vmem:[%s2996_s6 + $0x68] sm:$0x1] }
  0x78   : > { %v1150_v41 = vrot.slane %v1148_v56, 5 }
  0x7a   : > { %2522 = vmatmul.msk.bf16.gmra.mxu0 %vm435_vm3, %v1220_v5  ;;  %v1142_v5 = vshrl.u32 %v3276_v58, 16 }
  0x7c   : > { %2414 = vmatmul.msk.bf16.gmra.mxu1 %vm435_vm3, %v2681_v6  ;;  %v1144_v30 = vrot.slane %v1142_v5, 4 }
  0x7e   : > { %v1145_v28 = vor.u32 %v1144_v30, %v1140_v26  ;;  %v2516_v30 = vld [vmem:[%s2996_s6 + $0x60] sm:$0xf] }
  0x80   : > { %v1146_v39 = vrot.slane %v1145_v28, 4  ;;  %v1180_v28 = vshll.u32 %v2516_v30, 16 }
  0x82   : > { %2431 = vmatmul.msk.bf16.gmra.mxu2 %vm435_vm3, %v733_v32  ;;  %v1111_v32 = vor.u32 %v1110_v2, %v1107_v31  ;;  %v725_v31 = vunpack.c.l.b16 %v697_v23  ;;  %v2513_v2 = vld [vmem:[%s2996_s6 + $0x54] sm:$0xf]  ;;  %v1151_v48 = vsel %vm3024_vm4, %v1146_v39, %v1150_v41 }
  0x83   : > { %v1156_v19 = vshll.u32 %v2513_v2, 16 }
  0x84   : > { %v1112_v52 = vrot.slane %v1111_v32, 4 }
  0x85   : > { %v1158_v53 = vrot.slane %v1156_v19, 5 }
  0x86   : > { %2490 = vmatmul.msk.bf16.gmra.mxu3 %vm435_vm3, %v2689_v29  ;;  %v1117_v8 = vsel %vm3024_vm4, %v1112_v52, %v1116_v38  ;;  %v724_v29 = vunpack.c.l.b16 %v694_v22  ;;  %v1136_v38 = vrot.slane %v1135_v24, 4  ;;  %v1177_v24 = vshrl.u32 %v2516_v30, 16 }
  0x87   : > { %v1210_v6 = vunpack.c.l.b16 %v1117_v8  ;;  %v1164_v8 = vrot.slane %v1162_v47, 5  ;;  %v1182_v47 = vrot.slane %v1180_v28, 5 }
  0x88   : > { %v735_v32 = vpack.c.b16 %v725_v31, %v724_v29  ;;  %v1141_v12 = vsel %vm3024_vm4, %v1136_v38, %v1140_v26  ;;  %v1174_v26 = vrot.slane %v1172_v46, 5  ;;  %v707_v31 = vrot.slane %v3088_v15, 5  ;;  %v636_v38 = vld [vmem:[%s2996_s6 + $0x54] sm:$0xe] }
  0x89   : > { %v1222_v21 = vpack.c.b16 %v1211_v9, %v1210_v6  ;;  %v1212_v55 = vunpack.c.l.b16 %v1141_v12  ;;  %v1169_v9 = vor.u32 %v1168_v0, %v1164_v8  ;;  %v710_v15 = vrot.slane %v3091_v16, 5  ;;  %v2685_v0 = vld [vmem:[%s2996_s6 + $0x54] sm:$0xff] }
  0x8a   : > { %2523 = vmatmul.msk.bf16.gmra.mxu0 %vm435_vm3, %v1221_v45  ;;  %v1153_v45 = vshrl.u32 %v2513_v2, 16 }
  0x8b   : > { %v1170_v51 = vrot.slane %v1169_v9, 4 }
  0x8c   : > { %2415 = vmatmul.msk.bf16.gmra.mxu1 %vm435_vm3, %v2682_v49  ;;  %v700_v49 = vrot.slane %v3020_v35, 5  ;;  %v1155_v52 = vrot.slane %v1153_v45, 4  ;;  %v2692_v45 = vld [vmem:[%s2996_s6 + $0x54] sm:$0xff] }
  0x8e   : > { %v702_v60 = vrot.slane %v700_v49, 4  ;;  %v1159_v35 = vor.u32 %v1158_v53, %v1155_v52  ;;  %v701_v6 = vsel %vm3132_vm7, %v2425_v25, %v700_v49  ;;  %v709_v49 = vrot.slane %v707_v31, 4 }
  0x8f   : > { %v726_v14 = vunpack.c.l.b16 %v701_v6 }
  0x90   : > { %v1160_v57 = vrot.slane %v1159_v35, 4  ;;  %v711_v25 = vsel %vm3132_vm7, %v709_v49, %v710_v15  ;;  %v2693_v49 = vld [vmem:[%s2996_s6 + $0x60] sm:$0xff] }
  0x91   : > { %v729_v46 = vunpack.c.l.b16 %v711_v25 }
  0x92   : > { %2432 = vmatmul.msk.bf16.gmra.mxu2 %vm435_vm3, %v734_v59  ;;  %v1213_v59 = vunpack.c.l.b16 %v1151_v48  ;;  %v1165_v22 = vsel %vm3024_vm4, %v1160_v57, %v1164_v8  ;;  %v2426_v48 = vrot.slane %v636_v38, 9 }
  0x93   : > { %v1214_v39 = vunpack.c.l.b16 %v1165_v22  ;;  %v1355_v22 = vrot.slane %v3137_v37, 5 }
  0x94   : > { %v1223_v3 = vpack.c.b16 %v1213_v59, %v1212_v55  ;;  %v2612_v59 = vld [vmem:[%s2996_s6 + $0x18] sm:$0xf]  ;;  %v708_v8 = vsel %vm3132_vm7, %v2426_v48, %v707_v31 }
  0x95   : > { %v1703_v6 = vshrl.u32 %v2612_v59, 16  ;;  %v728_v9 = vunpack.c.l.b16 %v708_v8 }
  0x96   : > { %2491 = vmatmul.msk.bf16.gmra.mxu3 %vm435_vm3, %v2690_v7  ;;  %v704_v7 = vsel %vm3132_vm7, %v702_v60, %v703_v61  ;;  %v1196_v60 = vshll.u32 %v3350_v50, 16  ;;  %v3364_v61 = vld [vmem:[%s2996_s6 + $0x1c] sm:$0xf] }
  0x97   : > { %v727_v17 = vunpack.c.l.b16 %v704_v7  ;;  %v1706_v7 = vshll.u32 %v2612_v59, 16  ;;  %v1712_v57 = vshll.u32 %v3364_v61, 16  ;;  %v1705_v28 = vrot.slane %v1703_v6, 4 }
  0x98   : > { %v1198_v30 = vrot.slane %v1196_v60, 5  ;;  %v2046_v6 = vrot.slane %v3364_v61, 5 }
  0x99   : > { %v736_v23 = vpack.c.b16 %v727_v17, %v726_v14  ;;  %v1716_v14 = vshrl.u32 %v3364_v61, 16  ;;  %v1714_v31 = vrot.slane %v1712_v57, 5 }
  0x9a   : > { %2524 = vmatmul.msk.bf16.gmra.mxu0 %vm435_vm3, %v1222_v21  ;;  %v3331_v21 = vld [vmem:[%s2996_s6 + $0x64] sm:$0xf] }
  0x9b   : > { %v1186_v56 = vshll.u32 %v3331_v21, 16  ;;  %v1190_v2 = vshrl.u32 %v3331_v21, 16 }
  0x9c   : > { %2416 = vmatmul.msk.bf16.gmra.mxu1 %vm435_vm3, %v2683_v40  ;;  %v1175_v40 = vsel %vm3024_vm4, %v1170_v51, %v1174_v26 }
  0x9d   : > { %v1215_v19 = vunpack.c.l.b16 %v1175_v40  ;;  %v1188_v12 = vrot.slane %v1186_v56, 5  ;;  %v1192_v20 = vrot.slane %v1190_v2, 4  ;;  %v1708_v56 = vrot.slane %v1706_v7, 5 }
  0x9e   : > { %v737_v40 = vpack.c.b16 %v729_v46, %v728_v9  ;;  %v1718_v2 = vrot.slane %v1716_v14, 4  ;;  %v2615_v46 = vld [vmem:[%s2996_s6 + $0x24] sm:$0xf] }
  0x9f   : > { %v1193_v16 = vor.u32 %v1192_v20, %v1188_v12  ;;  %v1709_v48 = vor.u32 %v1708_v56, %v1705_v28  ;;  %v2529_v28 = vld [vmem:[%s2996_s6 + $0x18] sm:$0xe]  ;;  %v1727_v56 = vshrl.u32 %v2615_v46, 16 }
  0xa0   : > { %v1719_v20 = vor.u32 %v1718_v2, %v1714_v31 }
  0xa1   : > { %v1194_v26 = vrot.slane %v1193_v16, 4  ;;  %v1710_v25 = vrot.slane %v1709_v48, 4 }
  0xa2   : > { %2433 = vmatmul.msk.bf16.gmra.mxu2 %vm435_vm3, %v735_v32  ;;  %v1179_v32 = vrot.slane %v1177_v24, 4  ;;  %v1720_v60 = vrot.slane %v1719_v20, 4 }
  0xa3   : > { %v1199_v37 = vsel %vm3024_vm4, %v1194_v26, %v1198_v30  ;;  %v1359_v30 = vrot.slane %v3168_v4, 5 }
  0xa4   : > { %v1183_v55 = vor.u32 %v1182_v47, %v1179_v32 }
  0xa6   : > { %2492 = vmatmul.msk.bf16.gmra.mxu3 %vm435_vm3, %v2691_v54  ;;  %v1224_v54 = vpack.c.b16 %v1215_v19, %v1214_v39  ;;  %v1184_v51 = vrot.slane %v1183_v55, 4 }
  0xa7   : > { %v3320_v5 = vpop.f32.mrf.mxu1 }
  0xa8   : > { %v1189_v39 = vsel %vm3024_vm4, %v1184_v51, %v1188_v12  ;;  %v1217_v12 = vunpack.c.l.b16 %v1199_v37  ;;  %v1715_v51 = vsel %vm3024_vm4, %v1710_v25, %v1714_v31  ;;  %v1361_v37 = vrot.slane %v1359_v30, 4 }
  0xa9   : > { %v1216_v15 = vunpack.c.l.b16 %v1189_v39  ;;  %v2537_v39 = vrot.slane %v2529_v28, 9 }
  0xaa   : > { %2525 = vmatmul.msk.bf16.gmra.mxu0 %vm435_vm3, %v1223_v3  ;;  %v1352_v3 = vrot.slane %v3127_v27, 5 }
  0xab   : > { %v1225_v16 = vpack.c.b16 %v1217_v12, %v1216_v15  ;;  %v1729_v12 = vrot.slane %v1727_v56, 4 }
  0xac   : > { %2417 = vmatmul.msk.bf16.gmra.mxu1 %vm435_vm3, %v2684_v10  ;;  %v2528_v10 = vld [vmem:[%s2996_s6 + $0xc] sm:$0xe]  ;;  %v1354_v24 = vrot.slane %v1352_v3, 4 }
  0xae   : > { %v1356_v47 = vsel %vm3132_vm7, %v1354_v24, %v1355_v22 }
  0xaf   : > { %v3339_v29 = vpop.f32.mrf.mxu1  ;;  %v1409_v59 = vunpack.c.l.b16 %v1356_v47  ;;  %v1896_v47 = vunpack.c.l.b16 %v1715_v51 }
  0xb1   : > { %v3344_v41 = vpop.f32.mrf.mxu2 }
  0xb2   : > { %2434 = vmatmul.msk.bf16.gmra.mxu2 %vm435_vm3, %v736_v23  ;;  %v2536_v23 = vrot.slane %v2528_v10, 9  ;;  %v3404_v10 = vld [vmem:[%s2996_s6 + $0x28] sm:$0xf] }
  0xb3   : > { %v1736_v2 = vshll.u32 %v3404_v10, 16  ;;  %v1740_v31 = vshrl.u32 %v3404_v10, 16 }
  0xb4   : > { %v1353_v32 = vsel %vm3132_vm7, %v2536_v23, %v1352_v3  ;;  %v2645_v3 = vld [vmem:[%s2996_s6 + $0x18] sm:$0xe]  ;;  %v2048_v23 = vrot.slane %v2046_v6, 4 }
  0xb5   : > { %v3352_v52 = vpop.f32.mrf.mxu0  ;;  %v3354_v53 = vpop.f32.mrf.mxu3  ;;  %v1408_v55 = vunpack.c.l.b16 %v1353_v32  ;;  %v2653_v26 = vrot.slane %v2645_v3, 9  ;;  %v2694_v32 = vld [vmem:[%s2996_s6 + $0x18] sm:$0xff] }
  0xb6   : > { %2493 = vmatmul.msk.bf16.gmra.mxu3 %vm435_vm3, %v2692_v45  ;;  %v2614_v45 = vld [vmem:[%s2996_s6 + $0x20] sm:$0x1] }
  0xb7   : > { %v1424_v9 = vpack.c.b16 %v1409_v59, %v1408_v55  ;;  %v2049_v24 = vrot.slane %v2614_v45, 5  ;;  %v1742_v55 = vrot.slane %v1740_v31, 4  ;;  %v3430_v59 = vld [vmem:[%s2996_s6 + $0x2c] sm:$0x1] }
  0xb8   : > { %v1746_v51 = vshll.u32 %v3430_v59, 16 }
  0xb9   : > { %v3367_v35 = vpop.f32.mrf.mxu1  ;;  %v3374_v17 = vpop.f32.mrf.mxu2 }
  0xba   : > { %2526 = vmatmul.msk.bf16.gmra.mxu0 %vm435_vm3, %v1224_v54  ;;  %v1722_v54 = vshll.u32 %v2614_v45, 16  ;;  %v2047_v45 = vsel %vm3132_vm7, %v2653_v26, %v2046_v6 }
  0xbb   : > { %v2102_v3 = vunpack.c.l.b16 %v2047_v45 }
  0xbc   : > { %2418 = vmatmul.msk.bf16.gmra.mxu1 %vm435_vm3, %v2685_v0  ;;  %v1724_v0 = vrot.slane %v1722_v54, 5  ;;  %v1738_v54 = vrot.slane %v1736_v2, 5 }
  0xbd   : > { %v3378_v27 = vpop.f32.mrf.mxu0  ;;  %v3380_v38 = vpop.f32.mrf.mxu3 }
  0xbe   : > { %v1725_v22 = vsel %vm3024_vm4, %v1720_v60, %v1724_v0 }
  0xbf   : > { %v1897_v48 = vunpack.c.l.b16 %v1725_v22 }
  0xc1   : > { %v3387_v19 = vpop.f32.mrf.mxu1  ;;  %v1912_v0 = vpack.c.b16 %v1897_v48, %v1896_v47 }
  0xc2   : > { %2435 = vmatmul.msk.bf16.gmra.mxu2 %vm435_vm3, %v737_v40  ;;  %v1730_v40 = vshll.u32 %v2615_v46, 16 }
  0xc4   : > { %v1732_v20 = vrot.slane %v1730_v40, 5  ;;  %v3445_v40 = vld [vmem:[%s2996_s6 + $0x34] sm:$0xf] }
  0xc5   : > { %v3395_v8 = vpop.f32.mrf.mxu2 }
  0xc6   : > { %2494 = vmatmul.msk.bf16.gmra.mxu3 %vm435_vm3, %v2693_v49  ;;  %v2050_v49 = vsel %vm3132_vm7, %v2048_v23, %v2049_v24  ;;  %v1733_v46 = vor.u32 %v1732_v20, %v1729_v12  ;;  %v2646_v24 = vld [vmem:[%s2996_s6 + $0x24] sm:$0xe]  ;;  %v1366_v12 = vrot.slane %v3202_v62, 5  ;;  %v1760_v20 = vshll.u32 %v3445_v40, 16 }
  0xc7   : > { %v3400_v7 = vpop.f32.mrf.mxu0  ;;  %v2103_v6 = vunpack.c.l.b16 %v2050_v49 }
  0xc8   : > { %v1734_v31 = vrot.slane %v1733_v46, 4 }
  0xc9   : > { %v3406_v57 = vpop.f32.mrf.mxu3  ;;  %v589_v14 = vpop.f32.mrf.mxu1  ;;  %v2118_v28 = vpack.c.b16 %v2103_v6, %v2102_v3  ;;  %v2056_v3 = vrot.slane %v3430_v59, 5 }
  0xca   : > { %2527 = vmatmul.msk.bf16.gmra.mxu0 %vm435_vm3, %v1225_v16  ;;  %v590_v61 = vadd.f32 %v589_v14, %v3352_v52  ;;  %v1362_v52 = vrot.slane %v3187_v11, 5  ;;  %v1360_v16 = vsel %vm3132_vm7, %v2537_v39, %v1359_v30  ;;  %v1743_v14 = vor.u32 %v1742_v55, %v1738_v54  ;;  %v2618_v30 = vld [vmem:[%s2996_s6 + $0x30] sm:$0xf] }
  0xcb   : > { %v1410_v26 = vunpack.c.l.b16 %v1360_v16  ;;  %v1751_v47 = vshrl.u32 %v2618_v30, 16  ;;  %v1754_v48 = vshll.u32 %v2618_v30, 16  ;;  %v1369_v55 = vrot.slane %v3220_v34, 5 }
  0xcc   : > { %2545 = vmatmul.msk.bf16.vlgmr.msra.gmra.mxu1 %vm435_vm3, %v1424_v9  ;;  %v1363_v60 = vsel %vm3132_vm7, %v1361_v37, %v1362_v52  ;;  %v1744_v39 = vrot.slane %v1743_v14, 4  ;;  %v2053_v37 = vrot.slane %v3404_v10, 5  ;;  %v2530_v10 = vld [vmem:[%s2996_s6 + $0x24] sm:$0xe] }
  0xcd   : > { %v3419_v4 = vpop.f32.mrf.mxu2  ;;  %v1411_v22 = vunpack.c.l.b16 %v1363_v60  ;;  %v1739_v60 = vsel %vm3024_vm4, %v1734_v31, %v1738_v54  ;;  %v1753_v6 = vrot.slane %v1751_v47, 4  ;;  %v1756_v46 = vrot.slane %v1754_v48, 5 }
  0xce   : > { %v2055_v62 = vrot.slane %v2053_v37, 4  ;;  %v1762_v54 = vrot.slane %v1760_v20, 5  ;;  %v1898_v30 = vunpack.c.l.b16 %v1739_v60 }
  0xcf   : > { %v3427_v15 = vpop.f32.mrf.mxu0  ;;  %v1425_v52 = vpack.c.b16 %v1411_v22, %v1410_v26  ;;  %v1368_v26 = vrot.slane %v1366_v12, 4 }
  0xd0   : > { %v2057_v31 = vsel %vm3132_vm7, %v2055_v62, %v2056_v3  ;;  %v2647_v3 = vld [vmem:[%s2996_s6 + $0x30] sm:$0xe] }
  0xd1   : > { %v3432_v25 = vpop.f32.mrf.mxu3  ;;  %v591_v11 = vpop.f32.mrf.mxu1 }
  0xd2   : > { %2604 = vmatmul.msk.bf16.vlgmr.msra.gmra.mxu2 %vm435_vm3, %v2694_v32  ;;  %v592_v9 = vadd.f32 %v591_v11, %v3378_v27  ;;  %v1748_v27 = vrot.slane %v1746_v51, 5  ;;  %v2654_v32 = vrot.slane %v2646_v24, 9  ;;  %v2538_v51 = vrot.slane %v2530_v10, 9  ;;  %v2695_v24 = vld [vmem:[%s2996_s6 + $0x24] sm:$0xff] }
  0xd4   : > { %v2054_v34 = vsel %vm3132_vm7, %v2654_v32, %v2053_v37  ;;  %v1370_v32 = vsel %vm3132_vm7, %v1368_v26, %v1369_v55 }
  0xd5   : > { %v774_v23 = vpop.f32.mrf.mxu2 }
  0xd6   : > { %2637 = vmatmul.msk.bf16.vlgmr.msra.gmra.mxu3 %vm435_vm3, %v1912_v0  ;;  %v814_v56 = vadd.f32 %v774_v23, %v590_v61  ;;  %v1764_v61 = vshrl.u32 %v3445_v40, 16  ;;  %v1749_v0 = vsel %vm3024_vm4, %v1744_v39, %v1748_v27  ;;  %v2104_v39 = vunpack.c.l.b16 %v2054_v34 }
  0xd7   : > { %v1262_v2 = vpop.f32.mrf.mxu0  ;;  %v1757_v27 = vor.u32 %v1756_v46, %v1753_v6  ;;  %v2060_v46 = vrot.slane %v3445_v40, 5 }
  0xd8   : > { %v1766_v22 = vrot.slane %v1764_v61, 4 }
  0xd9   : > { %v928_v45 = vpop.f32.mrf.mxu3  ;;  %v594_v49 = vpop.f32.mrf.mxu1 }
  0xda   : > { %2662 = vmatmul.msk.bf16.vlgmr.msra.gmra.mxu0 %vm435_vm3, %v2118_v28  ;;  %v968_v11 = vadd.f32 %v928_v45, %v814_v56  ;;  %v595_v16 = vadd.f32 %v594_v49, %v3400_v7  ;;  %v1899_v28 = vunpack.c.l.b16 %v1749_v0  ;;  %v3467_v56 = vld [vmem:[%s2996_s6 + $0x38] sm:$0x1]  ;;  %v2105_v49 = vunpack.c.l.b16 %v2057_v31 }
  0xdb   : > { %v1770_v47 = vshll.u32 %v3467_v56, 16 }
  0xdc   : > { %2546 = vmatmul.msk.bf16.gmra.mxu1 %vm435_vm3, %v1425_v52  ;;  %v3463_v7 = vadd.f32 %v1262_v2, %v968_v11  ;;  %v1367_v52 = vsel %vm3132_vm7, %v2538_v51, %v1366_v12  ;;  %v1913_v45 = vpack.c.b16 %v1899_v28, %v1898_v30  ;;  %v1413_v11 = vunpack.c.l.b16 %v1370_v32  ;;  %v3485_v51 = vld [vmem:[%s2996_s6 + $0x40] sm:$0xf] }
  0xdd   : > { %v776_v14 = vpop.f32.mrf.mxu2  ;;  %v1412_v61 = vunpack.c.l.b16 %v1367_v52  ;;  %v1758_v12 = vrot.slane %v1757_v27, 4  ;;  %v1772_v0 = vrot.slane %v1770_v47, 5  ;;  %v2119_v55 = vpack.c.b16 %v2105_v49, %v2104_v39  ;;  %v2696_v49 = vld [vmem:[%s2996_s6 + $0x30] sm:$0xff] }
  0xde   : > { %v815_v23 = vadd.f32 %v776_v14, %v592_v9  ;;  %v1767_v9 = vor.u32 %v1766_v22, %v1762_v54  ;;  %v2621_v14 = vld [vmem:[%s2996_s6 + $0x3c] sm:$0xf]  ;;  %v1373_v30 = vrot.slane %v3228_v44, 5  ;;  %v2062_v27 = vrot.slane %v2060_v46, 4 }
  0xdf   : > { %v1264_v59 = vpop.f32.mrf.mxu0  ;;  %v1775_v31 = vshrl.u32 %v2621_v14, 16  ;;  %v1778_v39 = vshll.u32 %v2621_v14, 16  ;;  %v1376_v52 = vrot.slane %v3240_v63, 5 }
  0xe0   : > { %v1768_v60 = vrot.slane %v1767_v9, 4 }
  0xe1   : > { %v930_v37 = vpop.f32.mrf.mxu3  ;;  %v596_v2 = vpop.f32.mrf.mxu1 }
  0xe2   : > { %v969_v48 = vadd.f32 %v930_v37, %v815_v23  ;;  %2605 = vmatmul.msk.bf16.gmra.mxu2 %vm435_vm3, %v2695_v24  ;;  %v597_v20 = vadd.f32 %v596_v2, %v3427_v15  ;;  %v1426_v15 = vpack.c.b16 %v1413_v11, %v1412_v61  ;;  %v1763_v23 = vsel %vm3024_vm4, %v1758_v12, %v1762_v54 }
  0xe3   : > { %v1773_v24 = vsel %vm3024_vm4, %v1768_v60, %v1772_v0  ;;  %v2063_v37 = vrot.slane %v3467_v56, 5  ;;  %v1784_v54 = vshll.u32 %v3485_v51, 16  ;;  %v1788_v2 = vshrl.u32 %v3485_v51, 16  ;;  %v2623_v0 = vld [vmem:[%s2996_s6 + $0x44] sm:$0x1] }
  0xe4   : > { %v3480_v34 = vadd.f32 %v1264_v59, %v969_v48  ;;  %v2531_v59 = vld [vmem:[%s2996_s6 + $0x30] sm:$0xe]  ;;  %v1901_v9 = vunpack.c.l.b16 %v1773_v24  ;;  %v1375_v48 = vrot.slane %v1373_v30, 4  ;;  %v1777_v61 = vrot.slane %v1775_v31, 4  ;;  %v2648_v31 = vld [vmem:[%s2996_s6 + $0x3c] sm:$0xe] }
  0xe5   : > { %v779_v10 = vpop.f32.mrf.mxu2  ;;  %v2539_v47 = vrot.slane %v2531_v59, 9  ;;  %v1780_v11 = vrot.slane %v1778_v39, 5  ;;  %v2064_v63 = vsel %vm3132_vm7, %v2062_v27, %v2063_v37  ;;  %v1786_v12 = vrot.slane %v1784_v54, 5 }
  0xe6   : > { %2638 = vmatmul.msk.bf16.gmra.mxu3 %vm435_vm3, %v1913_v45  ;;  %v816_v62 = vadd.f32 %v779_v10, %v595_v16  ;;  %v2655_v16 = vrot.slane %v2647_v3, 9  ;;  %v1790_v60 = vrot.slane %v1788_v2, 4  ;;  %v1794_v24 = vshll.u32 %v2623_v0, 16  ;;  %v3519_v2 = vld [vmem:[%s2996_s6 + $0x4c] sm:$0xf] }
  0xe7   : > { %v1267_v6 = vpop.f32.mrf.mxu0 }
  0xe8   : > { %v2061_v56 = vsel %vm3132_vm7, %v2655_v16, %v2060_v46  ;;  %v1377_v46 = vsel %vm3132_vm7, %v1375_v48, %v1376_v52  ;;  %v2067_v16 = vrot.slane %v3485_v51, 5  ;;  %v2070_v48 = vrot.slane %v2623_v0, 5 }
  0xe9   : > { %v933_v26 = vpop.f32.mrf.mxu3  ;;  %v599_v22 = vpop.f32.mrf.mxu1  ;;  %v2106_v3 = vunpack.c.l.b16 %v2061_v56  ;;  %v1415_v59 = vunpack.c.l.b16 %v1377_v46 }
  0xea   : > { %2663 = vmatmul.msk.bf16.gmra.mxu0 %vm435_vm3, %v2119_v55  ;;  %v970_v28 = vadd.f32 %v933_v26, %v816_v62  ;;  %v600_v40 = vadd.f32 %v599_v22, %v3320_v5  ;;  %v1900_v5 = vunpack.c.l.b16 %v1763_v23  ;;  %v1781_v22 = vor.u32 %v1780_v11, %v1777_v61 }
  0xeb   : > { %v1791_v23 = vor.u32 %v1790_v60, %v1786_v12  ;;  %v2069_v51 = vrot.slane %v2067_v16, 4  ;;  %v1380_v11 = vrot.slane %v3248_v13, 5 }
  0xec   : > { %2547 = vmatmul.msk.bf16.gmra.mxu1 %vm435_vm3, %v1426_v15  ;;  %v3500_v44 = vadd.f32 %v1267_v6, %v970_v28  ;;  %v1914_v62 = vpack.c.b16 %v1901_v9, %v1900_v5  ;;  %v2107_v15 = vunpack.c.l.b16 %v2064_v63  ;;  %v1782_v54 = vrot.slane %v1781_v22, 4 }
  0xed   : > { %v781_v32 = vpop.f32.mrf.mxu2  ;;  %v1796_v5 = vrot.slane %v1794_v24, 5  ;;  %v2656_v9 = vrot.slane %v2648_v31, 9  ;;  %v1812_v63 = vshrl.u32 %v3519_v2, 16  ;;  %v2697_v24 = vld [vmem:[%s2996_s6 + $0x3c] sm:$0xff]  ;;  %v3545_v31 = vld [vmem:[%s2996_s6 + $0x50] sm:$0x1] }
  0xee   : > { %v817_v45 = vadd.f32 %v781_v32, %v597_v20  ;;  %v1374_v20 = vsel %vm3132_vm7, %v2539_v47, %v1373_v30  ;;  %v2624_v30 = vld [vmem:[%s2996_s6 + $0x48] sm:$0xf]  ;;  %v2120_v27 = vpack.c.b16 %v2107_v15, %v2106_v3  ;;  %v1792_v32 = vrot.slane %v1791_v23, 4 }
  0xef   : > { %v1269_v10 = vpop.f32.mrf.mxu0  ;;  %v1414_v28 = vunpack.c.l.b16 %v1374_v20  ;;  %v1787_v0 = vsel %vm3024_vm4, %v1782_v54, %v1786_v12  ;;  %v2068_v13 = vsel %vm3132_vm7, %v2656_v9, %v2067_v16  ;;  %v1382_v15 = vrot.slane %v1380_v11, 4 }
  0xf0   : > { %v1797_v3 = vsel %vm3024_vm4, %v1792_v32, %v1796_v5  ;;  %v1814_v22 = vrot.slane %v1812_v63, 4 }
  0xf1   : > { %v935_v55 = vpop.f32.mrf.mxu3  ;;  %v601_v6 = vpop.f32.mrf.mxu1  ;;  %v1427_v47 = vpack.c.b16 %v1415_v59, %v1414_v28  ;;  %v1902_v28 = vunpack.c.l.b16 %v1787_v0  ;;  %v1903_v16 = vunpack.c.l.b16 %v1797_v3  ;;  %v2074_v0 = vrot.slane %v3519_v2, 5 }
  0xf2   : > { %v971_v14 = vadd.f32 %v935_v55, %v817_v45  ;;  %2606 = vmatmul.msk.bf16.gmra.mxu2 %vm435_vm3, %v2696_v49  ;;  %v602_v26 = vadd.f32 %v601_v6, %v3339_v29  ;;  %v1799_v45 = vshrl.u32 %v2624_v30, 16  ;;  %v1802_v49 = vshll.u32 %v2624_v30, 16  ;;  %v2532_v55 = vld [vmem:[%s2996_s6 + $0x3c] sm:$0xe] }
  0xf3   : > { %v2071_v6 = vsel %vm3132_vm7, %v2069_v51, %v2070_v48  ;;  %v1915_v9 = vpack.c.b16 %v1903_v16, %v1902_v28  ;;  %v2076_v28 = vrot.slane %v2074_v0, 4  ;;  %v2077_v16 = vrot.slane %v3545_v31, 5 }
  0xf4   : > { %v3521_v52 = vadd.f32 %v1269_v10, %v971_v14  ;;  %v1804_v20 = vrot.slane %v1802_v49, 5  ;;  %v2540_v14 = vrot.slane %v2532_v55, 9  ;;  %v2109_v30 = vunpack.c.l.b16 %v2071_v6  ;;  %v2627_v49 = vld [vmem:[%s2996_s6 + $0x54] sm:$0xf] }
  0xf5   : > { %v784_v39 = vpop.f32.mrf.mxu2  ;;  %v1826_v6 = vshll.u32 %v2627_v49, 16 }
  0xf6   : > { %2639 = vmatmul.msk.bf16.gmra.mxu3 %vm435_vm3, %v1914_v62  ;;  %v818_v37 = vadd.f32 %v784_v39, %v600_v40  ;;  %v1808_v40 = vshll.u32 %v3519_v2, 16  ;;  %v1383_v62 = vrot.slane %v3263_v43, 5  ;;  %v2108_v39 = vunpack.c.l.b16 %v2068_v13 }
  0xf7   : > { %v1272_v29 = vpop.f32.mrf.mxu0  ;;  %v1381_v54 = vsel %vm3132_vm7, %v2540_v14, %v1380_v11  ;;  %v1823_v13 = vshrl.u32 %v2627_v49, 16  ;;  %v1387_v2 = vrot.slane %v3276_v58, 5  ;;  %v1390_v58 = vrot.slane %v3290_v18, 5 }
  0xf8   : > { %v3541_v12 = vrot.slane %v1808_v40, 5  ;;  %v1416_v48 = vunpack.c.l.b16 %v1381_v54  ;;  %v2078_v49 = vsel %vm3132_vm7, %v2076_v28, %v2077_v16  ;;  %v2630_v28 = vld [vmem:[%s2996_s6 + $0x60] sm:$0xf] }
  0xf9   : > { %v938_v56 = vpop.f32.mrf.mxu3  ;;  %v604_v61 = vpop.f32.mrf.mxu1 }
  0xfa   : > { %2664 = vmatmul.msk.bf16.gmra.mxu0 %vm435_vm3, %v2120_v27  ;;  %v972_v10 = vadd.f32 %v938_v56, %v818_v37  ;;  %v605_v60 = vadd.f32 %v604_v61, %v3367_v35  ;;  %v1801_v35 = vrot.slane %v1799_v45, 4  ;;  %v3557_v56 = vld [vmem:[%s2996_s6 + $0x58] sm:$0xf]  ;;  %v2121_v61 = vpack.c.b16 %v2109_v30, %v2108_v39 }
  0xfb   : > { %v1825_v39 = vrot.slane %v1823_v13, 4  ;;  %v1828_v30 = vrot.slane %v1826_v6, 5 }
  0xfc   : > { %2548 = vmatmul.msk.bf16.gmra.mxu1 %vm435_vm3, %v1427_v47  ;;  %v3539_v46 = vadd.f32 %v1272_v29, %v972_v10  ;;  %v1384_v29 = vsel %vm3132_vm7, %v1382_v15, %v1383_v62  ;;  %v1805_v32 = vor.u32 %v1804_v20, %v1801_v35  ;;  %v1818_v47 = vshll.u32 %v3545_v31, 16  ;;  %v2649_v62 = vld [vmem:[%s2996_s6 + $0x48] sm:$0xe] }
  0xfd   : > { %v786_v43 = vpop.f32.mrf.mxu2  ;;  %v1417_v45 = vunpack.c.l.b16 %v1384_v29  ;;  %v1832_v35 = vshll.u32 %v3557_v56, 16  ;;  %v1836_v20 = vshrl.u32 %v3557_v56, 16 }
  0xfe   : > { %v819_v23 = vadd.f32 %v786_v43, %v602_v26  ;;  %v1815_v26 = vor.u32 %v1814_v22, %v3541_v12  ;;  %v1806_v40 = vrot.slane %v1805_v32, 4  ;;  %v1820_v55 = vrot.slane %v1818_v47, 5 }
  0xff   : > { %v1274_v59 = vpop.f32.mrf.mxu0  ;;  %v1428_v43 = vpack.c.b16 %v1417_v45, %v1416_v48  ;;  %v2657_v22 = vrot.slane %v2649_v62, 9  ;;  %v1389_v32 = vrot.slane %v1387_v2, 4 }
 0x100   : > { %v1816_v63 = vrot.slane %v1815_v26, 4  ;;  %v3580_v26 = vld [vmem:[%s2996_s6 + $0x5c] sm:$0x1] }
 0x101   : > { %v940_v27 = vpop.f32.mrf.mxu3  ;;  %v606_v37 = vpop.f32.mrf.mxu1  ;;  %v2075_v45 = vsel %vm3132_vm7, %v2657_v22, %v2074_v0  ;;  %v1842_v18 = vshll.u32 %v3580_v26, 16  ;;  %v2650_v22 = vld [vmem:[%s2996_s6 + $0x54] sm:$0xe] }
 0x102   : > { %v973_v5 = vadd.f32 %v940_v27, %v819_v23  ;;  %2607 = vmatmul.msk.bf16.gmra.mxu2 %vm435_vm3, %v2697_v24  ;;  %v607_v51 = vadd.f32 %v606_v37, %v3387_v19  ;;  %v1821_v24 = vsel %vm3024_vm4, %v1816_v63, %v1820_v55  ;;  %v1834_v27 = vrot.slane %v1832_v35, 5 }
 0x103   : > { %v1838_v37 = vrot.slane %v1836_v20, 4  ;;  %v1905_v31 = vunpack.c.l.b16 %v1821_v24  ;;  %v2110_v0 = vunpack.c.l.b16 %v2075_v45  ;;  %v1397_v45 = vrot.slane %v3317_v1, 5 }
 0x104   : > { %v3562_v3 = vadd.f32 %v1274_v59, %v973_v5  ;;  %v2533_v59 = vld [vmem:[%s2996_s6 + $0x48] sm:$0xe] }
 0x105   : > { %v789_v11 = vpop.f32.mrf.mxu2  ;;  %v2541_v29 = vrot.slane %v2533_v59, 9 }
 0x106   : > { %2640 = vmatmul.msk.bf16.gmra.mxu3 %vm435_vm3, %v1915_v9  ;;  %v820_v10 = vadd.f32 %v789_v11, %v605_v60  ;;  %v1811_v60 = vsel %vm3024_vm4, %v1806_v40, %v3541_v12  ;;  %v2698_v9 = vld [vmem:[%s2996_s6 + $0x48] sm:$0xff]  ;;  %v1839_v11 = vor.u32 %v1838_v37, %v1834_v27  ;;  %v2658_v37 = vrot.slane %v2650_v22, 9 }
 0x107   : > { %v1277_v19 = vpop.f32.mrf.mxu0  ;;  %v1904_v47 = vunpack.c.l.b16 %v1811_v60 }
 0x108   : > { %v1840_v6 = vrot.slane %v1839_v11, 4 }
 0x109   : > { %v943_v14 = vpop.f32.mrf.mxu3  ;;  %v609_v15 = vpop.f32.mrf.mxu1  ;;  %v1916_v62 = vpack.c.b16 %v1905_v31, %v1904_v47  ;;  %v2084_v47 = vrot.slane %v3580_v26, 5  ;;  %v2534_v31 = vld [vmem:[%s2996_s6 + $0x54] sm:$0xe] }
 0x10a   : > { %2665 = vmatmul.msk.bf16.gmra.mxu0 %vm435_vm3, %v2121_v61  ;;  %v974_v23 = vadd.f32 %v943_v14, %v820_v10  ;;  %v1829_v61 = vor.u32 %v1828_v30, %v1825_v39  ;;  %v1391_v10 = vsel %vm3132_vm7, %v1389_v32, %v1390_v58  ;;  %v610_v35 = vadd.f32 %v609_v15, %v3344_v41  ;;  %v3601_v39 = vld [vmem:[%s2996_s6 + $0x64] sm:$0xf] }
 0x10b   : > { %v1844_v14 = vrot.slane %v1842_v18, 5  ;;  %v1847_v32 = vshrl.u32 %v2630_v28, 16 }
 0x10c   : > { %2549 = vmatmul.msk.bf16.gmra.mxu1 %vm435_vm3, %v1428_v43  ;;  %v3576_v12 = vadd.f32 %v1277_v19, %v974_v23  ;;  %v2111_v19 = vunpack.c.l.b16 %v2078_v49  ;;  %v1830_v13 = vrot.slane %v1829_v61, 4  ;;  %v1419_v43 = vunpack.c.l.b16 %v1391_v10 }
 0x10d   : > { %v791_v54 = vpop.f32.mrf.mxu2  ;;  %v1845_v15 = vsel %vm3024_vm4, %v1840_v6, %v1844_v14  ;;  %v1849_v10 = vrot.slane %v1847_v32, 4 }
 0x10e   : > { %v821_v5 = vadd.f32 %v791_v54, %v607_v51  ;;  %v1388_v51 = vsel %vm3132_vm7, %v2541_v29, %v1387_v2  ;;  %v2081_v2 = vrot.slane %v3557_v56, 5  ;;  %v2122_v23 = vpack.c.b16 %v2111_v19, %v2110_v0  ;;  %v2699_v0 = vld [vmem:[%s2996_s6 + $0x54] sm:$0xff] }
 0x10f   : > { %v1279_v48 = vpop.f32.mrf.mxu0  ;;  %v1418_v20 = vunpack.c.l.b16 %v1388_v51  ;;  %v1835_v41 = vsel %vm3024_vm4, %v1830_v13, %v1834_v27  ;;  %v1394_v29 = vrot.slane %v3302_v42, 5  ;;  %v1856_v27 = vshll.u32 %v3601_v39, 16  ;;  %v2632_v13 = vld [vmem:[%s2996_s6 + $0x68] sm:$0x1] }
 0x110   : > { %v2083_v54 = vrot.slane %v2081_v2, 4  ;;  %v1906_v49 = vunpack.c.l.b16 %v1835_v41  ;;  %v1907_v42 = vunpack.c.l.b16 %v1845_v15  ;;  %v2082_v11 = vsel %vm3132_vm7, %v2658_v37, %v2081_v2 }
 0x111   : > { %v945_v40 = vpop.f32.mrf.mxu3  ;;  %v611_v63 = vpop.f32.mrf.mxu1  ;;  %v1429_v30 = vpack.c.b16 %v1419_v43, %v1418_v20  ;;  %v1396_v51 = vrot.slane %v1394_v29, 4  ;;  %v2112_v6 = vunpack.c.l.b16 %v2082_v11 }
 0x112   : > { %v975_v55 = vadd.f32 %v945_v40, %v821_v5  ;;  %2608 = vmatmul.msk.bf16.gmra.mxu2 %vm435_vm3, %v2698_v9  ;;  %v1850_v5 = vshll.u32 %v2630_v28, 16  ;;  %v612_v61 = vadd.f32 %v611_v63, %v3374_v17  ;;  %v2542_v40 = vrot.slane %v2534_v31, 9 }
 0x113   : > { %v2085_v1 = vsel %vm3132_vm7, %v2083_v54, %v2084_v47  ;;  %v1858_v17 = vrot.slane %v1856_v27, 5  ;;  %v1866_v28 = vshll.u32 %v2632_v13, 16  ;;  %v2088_v31 = vrot.slane %v3601_v39, 5  ;;  %v2633_v27 = vld [vmem:[%s2996_s6 + $0x6c] sm:$0xf] }
 0x114   : > { %v3598_v16 = vadd.f32 %v1279_v48, %v975_v55  ;;  %v1860_v48 = vshrl.u32 %v3601_v39, 16  ;;  %v1852_v55 = vrot.slane %v1850_v5, 5  ;;  %v2113_v20 = vunpack.c.l.b16 %v2085_v1  ;;  %v2651_v5 = vld [vmem:[%s2996_s6 + $0x60] sm:$0xe] }
 0x115   : > { %v794_v60 = vpop.f32.mrf.mxu2  ;;  %v1395_v14 = vsel %vm3132_vm7, %v2542_v40, %v1394_v29  ;;  %v1868_v32 = vrot.slane %v1866_v28, 5  ;;  %v2535_v40 = vld [vmem:[%s2996_s6 + $0x60] sm:$0xe]  ;;  %v1871_v39 = vshrl.u32 %v2633_v27, 16  ;;  %v1404_v1 = vrot.slane %v3350_v50, 5 }
 0x116   : > { %2641 = vmatmul.msk.bf16.gmra.mxu3 %vm435_vm3, %v1916_v62  ;;  %v822_v24 = vadd.f32 %v794_v60, %v610_v35  ;;  %v1862_v63 = vrot.slane %v1860_v48, 4  ;;  %v1398_v60 = vsel %vm3132_vm7, %v1396_v51, %v1397_v45  ;;  %v1853_v22 = vor.u32 %v1852_v55, %v1849_v10 }
 0x117   : > { %v1282_v59 = vpop.f32.mrf.mxu0  ;;  %v1421_v41 = vunpack.c.l.b16 %v1398_v60  ;;  %v2123_v15 = vpack.c.b16 %v2113_v20, %v2112_v6  ;;  %v1874_v51 = vshll.u32 %v2633_v27, 16  ;;  %v2090_v10 = vrot.slane %v2088_v31, 4 }
 0x118   : > { %v2091_v55 = vrot.slane %v2632_v13, 5  ;;  %v2700_v13 = vld [vmem:[%s2996_s6 + $0x60] sm:$0xff] }
 0x119   : > { %v948_v56 = vpop.f32.mrf.mxu3  ;;  %v614_v58 = vpop.f32.mrf.mxu1 }
 0x11a   : > { %2666 = vmatmul.msk.bf16.gmra.mxu0 %vm435_vm3, %v2122_v23  ;;  %v976_v9 = vadd.f32 %v948_v56, %v822_v24  ;;  %v1917_v23 = vpack.c.b16 %v1907_v42, %v1906_v49  ;;  %v1863_v24 = vor.u32 %v1862_v63, %v1858_v17  ;;  %v1854_v56 = vrot.slane %v1853_v22, 4 }
 0x11b   : > { %v1401_v42 = vrot.slane %v3331_v21, 5  ;;  %v1873_v22 = vrot.slane %v1871_v39, 4 }
 0x11c   : > { %2550 = vmatmul.msk.bf16.gmra.mxu1 %vm435_vm3, %v1429_v30  ;;  %v3618_v18 = vadd.f32 %v1282_v59, %v976_v9  ;;  %v615_v59 = vadd.f32 %v614_v58, %v3395_v8  ;;  %v1420_v30 = vunpack.c.l.b16 %v1395_v14  ;;  %v1864_v29 = vrot.slane %v1863_v24, 4  ;;  %v3637_v58 = vld [vmem:[%s2996_s6 + $0x70] sm:$0xf]  ;;  %v2635_v24 = vld [vmem:[%s2996_s6 + $0x74] sm:$0x1] }
 0x11d   : > { %v796_v26 = vpop.f32.mrf.mxu2  ;;  %v1859_v49 = vsel %vm3024_vm4, %v1854_v56, %v1858_v17  ;;  %v1403_v20 = vrot.slane %v1401_v42, 4  ;;  %v2095_v39 = vrot.slane %v3637_v58, 5 }
 0x11e   : > { %v823_v62 = vadd.f32 %v796_v26, %v612_v61  ;;  %v1430_v8 = vpack.c.b16 %v1421_v41, %v1420_v30  ;;  %v2659_v61 = vrot.slane %v2651_v5, 9  ;;  %v1869_v26 = vsel %vm3024_vm4, %v1864_v29, %v1868_v32 }
 0x11f   : > { %v1284_v19 = vpop.f32.mrf.mxu0  ;;  %v1909_v6 = vunpack.c.l.b16 %v1869_v26  ;;  %v1890_v5 = vshll.u32 %v2635_v24, 16 }
 0x120   : > { %v2089_v60 = vsel %vm3132_vm7, %v2659_v61, %v2088_v31 }
 0x121   : > { %v950_v35 = vpop.f32.mrf.mxu3  ;;  %v616_v43 = vpop.f32.mrf.mxu1 }
 0x122   : > { %v977_v2 = vadd.f32 %v950_v35, %v823_v62  ;;  %2609 = vmatmul.msk.bf16.gmra.mxu2 %vm435_vm3, %v2699_v0  ;;  %v1880_v62 = vshll.u32 %v3637_v58, 16  ;;  %v1884_v0 = vshrl.u32 %v3637_v58, 16  ;;  %v617_v21 = vadd.f32 %v616_v43, %v3419_v4 }
 0x123   : > { %v2543_v35 = vrot.slane %v2535_v40, 9  ;;  %v2092_v4 = vsel %vm3132_vm7, %v2090_v10, %v2091_v55  ;;  %v1892_v40 = vrot.slane %v1890_v5, 5  ;;  %v2652_v10 = vld [vmem:[%s2996_s6 + $0x6c] sm:$0xe] }
 0x124   : > { %v3632_v9 = vadd.f32 %v1284_v19, %v977_v2  ;;  %v1908_v19 = vunpack.c.l.b16 %v1859_v49  ;;  %v1876_v2 = vrot.slane %v1874_v51, 5  ;;  %v1882_v43 = vrot.slane %v1880_v62, 5 }
 0x125   : > { %v799_v37 = vpop.f32.mrf.mxu2  ;;  %v1402_v41 = vsel %vm3132_vm7, %v2543_v35, %v1401_v42 }
 0x126   : > { %2642 = vmatmul.msk.bf16.gmra.mxu3 %vm435_vm3, %v1917_v23  ;;  %v824_v54 = vadd.f32 %v799_v37, %v615_v59  ;;  %v1886_v23 = vrot.slane %v1884_v0, 4  ;;  %v2114_v59 = vunpack.c.l.b16 %v2089_v60  ;;  %v1918_v56 = vpack.c.b16 %v1909_v6, %v1908_v19 }
 0x127   : > { %v1287_v47 = vpop.f32.mrf.mxu0  ;;  %v1877_v29 = vor.u32 %v1876_v2, %v1873_v22  ;;  %v1422_v31 = vunpack.c.l.b16 %v1402_v41 }
 0x128   : > { %v1887_v32 = vor.u32 %v1886_v23, %v1882_v43 }
 0x129   : > { %v953_v48 = vpop.f32.mrf.mxu3  ;;  %v619_v45 = vpop.f32.mrf.mxu1  ;;  %v1878_v42 = vrot.slane %v1877_v29, 4 }
 0x12a   : > { %2667 = vmatmul.msk.bf16.gmra.mxu0 %vm435_vm3, %v2123_v15  ;;  %v978_v11 = vadd.f32 %v953_v48, %v824_v54  ;;  %v1405_v15 = vsel %vm3132_vm7, %v1403_v20, %v1404_v1  ;;  %v2115_v54 = vunpack.c.l.b16 %v2092_v4  ;;  %v1888_v26 = vrot.slane %v1887_v32, 4  ;;  %v2701_v20 = vld [vmem:[%s2996_s6 + $0x6c] sm:$0xff]  ;;  %s2702_s6 = sshll.u32 %s2859_s15, 4 }
 0x12b   : > { %v1423_v27 = vunpack.c.l.b16 %v1405_v15  ;;  %v1883_v62 = vsel %vm3024_vm4, %v1878_v42, %v1882_v43  ;;  %v2660_v1 = vrot.slane %v2652_v10, 9  ;;  %s2268_s8 = sadd.s32 %s2702_s6, %s2673_s7  ;;  %s2801_s6 = scalar_lea.hbm %s3818_s3, 512 }
 0x12c   : > { %2551 = vmatmul.msk.bf16.gmra.mxu1 %vm435_vm3, %v1430_v8  ;;  %v3651_v17 = vadd.f32 %v1287_v47, %v978_v11  ;;  %v620_v47 = vadd.f32 %v619_v45, %v3354_v53  ;;  %v2124_v49 = vpack.c.b16 %v2115_v54, %v2114_v59  ;;  %v1893_v0 = vsel %vm3024_vm4, %v1888_v26, %v1892_v40  ;;  %s2674_s9 = sshll.u32 %s2268_s8, 3 }
 0x12d   : > { %v801_v63 = vpop.f32.mrf.mxu2  ;;  %v1431_v51 = vpack.c.b16 %v1423_v27, %v1422_v31  ;;  %v2096_v22 = vsel %vm3132_vm7, %v2660_v1, %v2095_v39  ;;  %s2270_s10 = scalar_lea.hbm %s3818_s3, %s2674_s9 }
 0x12e   : > { %v825_v14 = vadd.f32 %v801_v63, %v617_v21  ;;  %v2097_v21 = vrot.slane %v2095_v39, 4  ;;  %v2098_v63 = vrot.slane %v2635_v24, 5  ;;  %v2116_v43 = vunpack.c.l.b16 %v2096_v22  ;;  %v3702_v39 = vld [vmem:[%s3817_s2] ss:$0 sm:$0xff]  ;;  %s2273_s20 = sshll.u32 %s2270_s10, 4  ;;  %s2274_s20 = int_to_ptr.hbm [resolvable:$true] %s2273_s20 }
 0x12f   : > { %v1289_v50 = vpop.f32.mrf.mxu0  ;;  %s2795_s24 = sshra.s32 %s2274_s20, 4  ;;  %s2796_s24 = int_to_ptr.hbm [resolvable:$true] %s2795_s24 }
 0x130   : > { %v2099_v36 = vsel %vm3132_vm7, %v2097_v21, %v2098_v63  ;;  %s2797_s28 = scalar_lea.hbm %s2796_s24, 128  ;;  %p2802_p2 = scmp.lt.s32.totalorder %s2796_s24, %s3818_s3 }
 0x131   : > { %v955_v28 = vpop.f32.mrf.mxu3  ;;  %v621_v30 = vpop.f32.mrf.mxu1  ;;  %v2117_v23 = vunpack.c.l.b16 %v2099_v36  ;;  %p2798_p13 = scmp.ne.s32.totalorder %s2796_s24, %s2797_s28  ;;  %p2803_p4 = scmp.lt.s32.totalorder %s2801_s6, %s2797_s28 }
 0x132   : > { %v979_v37 = vadd.f32 %v955_v28, %v825_v14  ;;  %2610 = vmatmul.msk.bf16.gmra.mxu2 %vm435_vm3, %v2700_v13  ;;  %v622_v19 = vadd.f32 %v621_v30, %v3380_v38  ;;  %v1910_v14 = vunpack.c.l.b16 %v1883_v62  ;;  %v1911_v13 = vunpack.c.l.b16 %v1893_v0 }
 0x133   : > { %v2125_v30 = vpack.c.b16 %v2117_v23, %v2116_v43  ;;  %p2799_p0 = pnand %p2798_p13, %p2950_p3  ;;  %p2804_p5 = por %p2803_p4, %p2802_p2 }
 0x134   : > { %v3665_v8 = vadd.f32 %v1289_v50, %v979_v37  ;;  %v1919_v38 = vpack.c.b16 %v1911_v13, %v1910_v14 }
 0x135   : > { %v804_v48 = vpop.f32.mrf.mxu2  ;;  %p2800_p1 = pneg %p2799_p0 }
 0x136   : > { %2643 = vmatmul.msk.bf16.gmra.mxu3 %vm435_vm3, %v1918_v56  ;;  %v826_v61 = vadd.f32 %v804_v48, %v620_v47 }
 0x137   : > { %v1292_v11 = vpop.f32.mrf.mxu0  ;;  %p2805_p6 = pnand %p2804_p5, %p2800_p1 }
 0x139   : > { %v958_v55 = vpop.f32.mrf.mxu3  ;;  %v624_v53 = vpop.f32.mrf.mxu1 }
 0x13a   : > { %2668 = vmatmul.msk.bf16.gmra.mxu0 %vm435_vm3, %v2124_v49  ;;  %v980_v45 = vadd.f32 %v958_v55, %v826_v61  ;;  %v625_v24 = vadd.f32 %v624_v53, %v3406_v57 }
 0x13c   : > { %2552 = vmatmul.msk.bf16.gmra.mxu1 %vm435_vm3, %v1431_v51  ;;  %v3677_v58 = vadd.f32 %v1292_v11, %v980_v45 }
 0x13d   : > { %v806_v6 = vpop.f32.mrf.mxu2 }
 0x13e   : > { %v827_v35 = vadd.f32 %v806_v6, %v622_v19 }
 0x13f   : > { %v1294_v60 = vpop.f32.mrf.mxu0 }
 0x141   : > { %v960_v2 = vpop.f32.mrf.mxu3  ;;  %v626_v50 = vpop.f32.mrf.mxu1 }
 0x142   : > { %v981_v4 = vadd.f32 %v960_v2, %v827_v35  ;;  %2611 = vmatmul.msk.bf16.gmra.mxu2 %vm435_vm3, %v2701_v20  ;;  %v627_v54 = vadd.f32 %v626_v50, %v3432_v25 }
 0x144   : > { %v3686_v28 = vadd.f32 %v1294_v60, %v981_v4 }
 0x145   : > { %v809_v59 = vpop.f32.mrf.mxu2 }
 0x146   : > { %2644 = vmatmul.msk.bf16.gmra.mxu3 %vm435_vm3, %v1919_v38  ;;  %v828_v41 = vadd.f32 %v809_v59, %v625_v24 }
 0x147   : > { %v1297_v15 = vpop.f32.mrf.mxu0 }
 0x149   : > { %v963_v33 = vpop.f32.mrf.mxu3  ;;  %v1468_v37 = vpop.f32.mrf.mxu1 }
 0x14a   : > { %2669 = vmatmul.msk.bf16.gmra.mxu0 %vm435_vm3, %v2125_v30  ;;  %v982_v56 = vadd.f32 %v963_v33, %v828_v41  ;;  %v1508_v48 = vadd.f32 %v1468_v37, %v3463_v7 }
 0x14c   : > { %v3691_v29 = vadd.f32 %v1297_v15, %v982_v56 }
 0x14d   : > { %v811_v57 = vpop.f32.mrf.mxu2 }
 0x14e   : > { %v829_v32 = vadd.f32 %v811_v57, %v627_v54 }
 0x14f   : > { %v1299_v5 = vpop.f32.mrf.mxu0 }
 0x151   : > { %v965_v47 = vpop.f32.mrf.mxu3  ;;  %v1470_v31 = vpop.f32.mrf.mxu1 }
 0x152   : > { %v983_v27 = vadd.f32 %v965_v47, %v829_v32  ;;  %v1509_v10 = vadd.f32 %v1470_v31, %v3480_v34 }
 0x154   : > { %v3694_v49 = vadd.f32 %v1299_v5, %v983_v27 }
 0x155   : > { %v1622_v61 = vpop.f32.mrf.mxu2 }
 0x156   : > { %v1662_v42 = vadd.f32 %v1622_v61, %v1508_v48 }
 0x157   : > { %v2162_v11 = vpop.f32.mrf.mxu0 }
 0x159   : > { %v1956_v26 = vpop.f32.mrf.mxu3  ;;  %v1473_v40 = vpop.f32.mrf.mxu1 }
 0x15a   : > { %v1996_v25 = vadd.f32 %v1956_v26, %v1662_v42  ;;  %v1510_v63 = vadd.f32 %v1473_v40, %v3500_v44 }
 0x15c   : > { %v2202_v51 = vadd.f32 %v2162_v11, %v1996_v25 }
 0x15d   : > { %v1624_v7 = vpop.f32.mrf.mxu2 }
 0x15e   : > { %v2222_v55 = vadd.f32 %v3702_v39, %v2202_v51  ;;  %v1663_v53 = vadd.f32 %v1624_v7, %v1509_v10 }
 0x15f   : > { %v2164_v45 = vpop.f32.mrf.mxu0 }
 0x160   : > { %2239 = vst.msk [vmem:[%s3706_s5] sm:$0xff] %vm2238_vm8, %v2222_v55 }
 0x161   : > { %v1958_v62 = vpop.f32.mrf.mxu3  ;;  %v1475_v0 = vpop.f32.mrf.mxu1 }
 0x162   : > { %v1997_v1 = vadd.f32 %v1958_v62, %v1663_v53  ;;  %v1511_v22 = vadd.f32 %v1475_v0, %v3521_v52 }
 0x164   : > { %v2203_v21 = vadd.f32 %v2164_v45, %v1997_v1 }
 0x165   : > { %v1627_v34 = vpop.f32.mrf.mxu2 }
 0x166   : > { %v2223_v19 = vadd.f32 %v3702_v39, %v2203_v21  ;;  %v1664_v6 = vadd.f32 %v1627_v34, %v1510_v63 }
 0x167   : > { %v2167_v35 = vpop.f32.mrf.mxu0 }
 0x168   : > { %2240 = vst.msk [vmem:[%s3706_s5 + $0x8] sm:$0xff] %vm2238_vm8, %v2223_v19 }
 0x169   : > { %v1961_v20 = vpop.f32.mrf.mxu3  ;;  %v1478_v14 = vpop.f32.mrf.mxu1 }
 0x16a   : > { %v1998_v13 = vadd.f32 %v1961_v20, %v1664_v6  ;;  %v1512_v24 = vadd.f32 %v1478_v14, %v3539_v46 }
 0x16c   : > { %v2204_v60 = vadd.f32 %v2167_v35, %v1998_v13 }
 0x16d   : > { %v1629_v36 = vpop.f32.mrf.mxu2 }
 0x16e   : > { %v2224_v2 = vadd.f32 %v3702_v39, %v2204_v60  ;;  %v1665_v50 = vadd.f32 %v1629_v36, %v1511_v22 }
 0x16f   : > { %v2169_v4 = vpop.f32.mrf.mxu0 }
 0x170   : > { %2241 = vst.msk [vmem:[%s3706_s5 + $0x10] sm:$0xff] %vm2238_vm8, %v2224_v2 }
 0x171   : > { %v1963_v44 = vpop.f32.mrf.mxu3  ;;  %v1480_v38 = vpop.f32.mrf.mxu1 }
 0x172   : > { %v1999_v43 = vadd.f32 %v1963_v44, %v1665_v50  ;;  %v1513_v54 = vadd.f32 %v1480_v38, %v3562_v3 }
 0x174   : > { %v2205_v23 = vadd.f32 %v2169_v4, %v1999_v43 }
 0x175   : > { %v1632_v59 = vpop.f32.mrf.mxu2 }
 0x176   : > { %v2225_v30 = vadd.f32 %v3702_v39, %v2205_v23  ;;  %v1666_v41 = vadd.f32 %v1632_v59, %v1512_v24 }
 0x177   : > { %v2172_v15 = vpop.f32.mrf.mxu0 }
 0x178   : > { %2242 = vst.msk [vmem:[%s3706_s5 + $0x18] sm:$0xff] %vm2238_vm8, %v2225_v30 }
 0x179   : > { %v1966_v52 = vpop.f32.mrf.mxu3  ;;  %v1483_v33 = vpop.f32.mrf.mxu1 }
 0x17a   : > { %v2000_v37 = vadd.f32 %v1966_v52, %v1666_v41  ;;  %v1514_v61 = vadd.f32 %v1483_v33, %v3576_v12 }
 0x17c   : > { %v2206_v56 = vadd.f32 %v2172_v15, %v2000_v37 }
 0x17d   : > { %v1634_v57 = vpop.f32.mrf.mxu2 }
 0x17e   : > { %v2226_v32 = vadd.f32 %v3702_v39, %v2206_v56  ;;  %v1667_v5 = vadd.f32 %v1634_v57, %v1513_v54 }
 0x17f   : > { %v2174_v47 = vpop.f32.mrf.mxu0 }
 0x180   : > { %2243 = vst.msk [vmem:[%s3706_s5 + $0x20] sm:$0xff] %vm2238_vm8, %v2226_v32 }
 0x181   : > { %v1968_v46 = vpop.f32.mrf.mxu3  ;;  %v1485_v31 = vpop.f32.mrf.mxu1 }
 0x182   : > { %v2001_v27 = vadd.f32 %v1968_v46, %v1667_v5  ;;  %v1515_v7 = vadd.f32 %v1485_v31, %v3598_v16 }
 0x184   : > { %v2207_v48 = vadd.f32 %v2174_v47, %v2001_v27 }
 0x185   : > { %v1637_v42 = vpop.f32.mrf.mxu2 }
 0x186   : > { %v2227_v11 = vadd.f32 %v3702_v39, %v2207_v48  ;;  %v1668_v26 = vadd.f32 %v1637_v42, %v1514_v61 }
 0x187   : > { %v2177_v40 = vpop.f32.mrf.mxu0 }
 0x188   : > { %2244 = vst.msk [vmem:[%s3706_s5 + $0x28] sm:$0xff] %vm2238_vm8, %v2227_v11 }
 0x189   : > { %v1971_v3 = vpop.f32.mrf.mxu3  ;;  %v1488_v25 = vpop.f32.mrf.mxu1 }
 0x18a   : > { %v2002_v51 = vadd.f32 %v1971_v3, %v1668_v26  ;;  %v1516_v63 = vadd.f32 %v1488_v25, %v3618_v18 }
 0x18c   : > { %v2208_v10 = vadd.f32 %v2177_v40, %v2002_v51 }
 0x18d   : > { %v1639_v55 = vpop.f32.mrf.mxu2 }
 0x18e   : > { %v2228_v53 = vadd.f32 %v3702_v39, %v2208_v10  ;;  %v1669_v45 = vadd.f32 %v1639_v55, %v1515_v7 }
 0x18f   : > { %v2179_v62 = vpop.f32.mrf.mxu0 }
 0x190   : > { %2245 = vst.msk [vmem:[%s3706_s5 + $0x30] sm:$0xff] %vm2238_vm8, %v2228_v53 }
 0x191   : > { %v1973_v12 = vpop.f32.mrf.mxu3  ;;  %v1490_v0 = vpop.f32.mrf.mxu1 }
 0x192   : > { %v2003_v1 = vadd.f32 %v1973_v12, %v1669_v45  ;;  %v1517_v60 = vadd.f32 %v1490_v0, %v3632_v9 }
 0x194   : > { %v2209_v21 = vadd.f32 %v2179_v62, %v2003_v1 }
 0x195   : > { %v1642_v34 = vpop.f32.mrf.mxu2 }
 0x196   : > { %v2229_v19 = vadd.f32 %v3702_v39, %v2209_v21  ;;  %v1670_v6 = vadd.f32 %v1642_v34, %v1516_v63 }
 0x197   : > { %v2182_v35 = vpop.f32.mrf.mxu0 }
 0x198   : > { %2246 = vst.msk [vmem:[%s3706_s5 + $0x38] sm:$0xff] %vm2238_vm8, %v2229_v19 }
 0x199   : > { %v1976_v16 = vpop.f32.mrf.mxu3  ;;  %v1493_v20 = vpop.f32.mrf.mxu1 }
 0x19a   : > { %v2004_v14 = vadd.f32 %v1976_v16, %v1670_v6  ;;  %v1518_v43 = vadd.f32 %v1493_v20, %v3651_v17 }
 0x19c   : > { %v2210_v13 = vadd.f32 %v2182_v35, %v2004_v14 }
 0x19d   : > { %v1644_v22 = vpop.f32.mrf.mxu2 }
 0x19e   : > { %v2230_v36 = vadd.f32 %v3702_v39, %v2210_v13  ;;  %v1671_v2 = vadd.f32 %v1644_v22, %v1517_v60 }
 0x19f   : > { %v2184_v50 = vpop.f32.mrf.mxu0 }
 0x1a0   : > { %2247 = vst.msk [vmem:[%s3706_s5 + $0x40] sm:$0xff] %vm2238_vm8, %v2230_v36 }
 0x1a1   : > { %v1978_v18 = vpop.f32.mrf.mxu3  ;;  %v1495_v4 = vpop.f32.mrf.mxu1 }
 0x1a2   : > { %v2005_v44 = vadd.f32 %v1978_v18, %v1671_v2  ;;  %v1519_v33 = vadd.f32 %v1495_v4, %v3665_v8 }
 0x1a4   : > { %v2211_v38 = vadd.f32 %v2184_v50, %v2005_v44 }
 0x1a5   : > { %v1647_v23 = vpop.f32.mrf.mxu2 }
 0x1a6   : > { %v2231_v24 = vadd.f32 %v3702_v39, %v2211_v38  ;;  %v1672_v59 = vadd.f32 %v1647_v23, %v1518_v43 }
 0x1a7   : > { %v2187_v30 = vpop.f32.mrf.mxu0 }
 0x1a8   : > { %2248 = vst.msk [vmem:[%s3706_s5 + $0x48] sm:$0xff] %vm2238_vm8, %v2231_v24 }
 0x1a9   : > { %v1981_v9 = vpop.f32.mrf.mxu3  ;;  %v1498_v15 = vpop.f32.mrf.mxu1 }
 0x1aa   : > { %v2006_v41 = vadd.f32 %v1981_v9, %v1672_v59  ;;  %v1520_v47 = vadd.f32 %v1498_v15, %v3677_v58 }
 0x1ac   : > { %v2212_v52 = vadd.f32 %v2187_v30, %v2006_v41 }
 0x1ad   : > { %v1649_v37 = vpop.f32.mrf.mxu2 }
 0x1ae   : > { %v2232_v56 = vadd.f32 %v3702_v39, %v2212_v52  ;;  %v1673_v54 = vadd.f32 %v1649_v37, %v1519_v33 }
 0x1af   : > { %v2189_v57 = vpop.f32.mrf.mxu0 }
 0x1b0   : > { %2249 = vst.msk [vmem:[%s3706_s5 + $0x50] sm:$0xff] %vm2238_vm8, %v2232_v56 }
 0x1b1   : > { %v1983_v17 = vpop.f32.mrf.mxu3  ;;  %v1500_v46 = vpop.f32.mrf.mxu1 }
 0x1b2   : > { %v2007_v32 = vadd.f32 %v1983_v17, %v1673_v54  ;;  %v1521_v26 = vadd.f32 %v1500_v46, %v3686_v28 }
 0x1b4   : > { %v2213_v5 = vadd.f32 %v2189_v57, %v2007_v32 }
 0x1b5   : > { %v1652_v31 = vpop.f32.mrf.mxu2 }
 0x1b6   : > { %v2233_v27 = vadd.f32 %v3702_v39, %v2213_v5  ;;  %v1674_v48 = vadd.f32 %v1652_v31, %v1520_v47 }
 0x1b7   : > { %v2192_v61 = vpop.f32.mrf.mxu0 }
 0x1b8   : > { %2250 = vst.msk [vmem:[%s3706_s5 + $0x58] sm:$0xff] %vm2238_vm8, %v2233_v27 }
 0x1b9   : > { %v1986_v8 = vpop.f32.mrf.mxu3  ;;  %v1503_v25 = vpop.f32.mrf.mxu1 }
 0x1ba   : > { %v2008_v42 = vadd.f32 %v1986_v8, %v1674_v48  ;;  %v1522_v53 = vadd.f32 %v1503_v25, %v3691_v29 }
 0x1bc   : > { %v2214_v11 = vadd.f32 %v2192_v61, %v2008_v42 }
 0x1bd   : > { %v1654_v40 = vpop.f32.mrf.mxu2 }
 0x1be   : > { %v2234_v58 = vadd.f32 %v3702_v39, %v2214_v11  ;;  %v1675_v3 = vadd.f32 %v1654_v40, %v1521_v26 }
 0x1bf   : > { %v2194_v51 = vpop.f32.mrf.mxu0 }
 0x1c0   : > { %2251 = vst.msk [vmem:[%s3706_s5 + $0x60] sm:$0xff] %vm2238_vm8, %v2234_v58 }
 0x1c1   : > { %v1988_v10 = vpop.f32.mrf.mxu3  ;;  %v1505_v28 = vpop.f32.mrf.mxu1 }
 0x1c2   : > { %v2009_v7 = vadd.f32 %v1988_v10, %v1675_v3  ;;  %v1523_v34 = vadd.f32 %v1505_v28, %v3694_v49 }
 0x1c4   : > { %v2215_v55 = vadd.f32 %v2194_v51, %v2009_v7 }
 0x1c5   : > { %v1657_v45 = vpop.f32.mrf.mxu2 }
 0x1c6   : > { %v2235_v62 = vadd.f32 %v3702_v39, %v2215_v55  ;;  %v1676_v12 = vadd.f32 %v1657_v45, %v1522_v53 }
 0x1c7   : > { %v2197_v0 = vpop.f32.mrf.mxu0 }
 0x1c8   : > { %2252 = vst.msk [vmem:[%s3706_s5 + $0x68] sm:$0xff] %vm2238_vm8, %v2235_v62 }
 0x1c9   : > { %v1991_v1 = vpop.f32.mrf.mxu3 }
 0x1ca   : > { %v2010_v21 = vadd.f32 %v1991_v1, %v1676_v12 }
 0x1cc   : > { %v2216_v63 = vadd.f32 %v2197_v0, %v2010_v21 }
 0x1cd   : > { %v1659_v29 = vpop.f32.mrf.mxu2 }
 0x1ce   : > { %v2236_v19 = vadd.f32 %v3702_v39, %v2216_v63  ;;  %v1677_v6 = vadd.f32 %v1659_v29, %v1523_v34 }
 0x1cf   : > { %v2199_v20 = vpop.f32.mrf.mxu0 }
 0x1d0   : > { %2253 = vst.msk [vmem:[%s3706_s5 + $0x70] sm:$0xff] %vm2238_vm8, %v2236_v19 }
 0x1d1   : > { %v1993_v35 = vpop.f32.mrf.mxu3 }
 0x1d2   : > { %v2011_v16 = vadd.f32 %v1993_v35, %v1677_v6 }
 0x1d4   : > { %v2217_v49 = vadd.f32 %v2199_v20, %v2011_v16 }
 0x1d6   : > { %v2237_v14 = vadd.f32 %v3702_v39, %v2217_v49 }
 0x1d8   : > { %2254 = vst.msk [vmem:[%s3706_s5 + $0x78] sm:$0xff] %vm2238_vm8, %v2237_v14 }
 0x1d9   : > { %2808 = shalt.err (!%p2805_p6)
}
 0x1da   : > { %s2877_s27 = smov 128   ;;  %s2878_s5 = smov 8  }
 0x1db   : > { %2707 = dma.vmem_to_hbm [thread:$0]  (%p2950_p3), %s2272_s11, 2048, %s2274_s20, %s2256_s21, %s2877_s27, %s2877_s27, %s2878_s5  }
 0x1dc PF: > { %p2713_p7 = scmp.ge.s32.totalorder %s2875_s19, 2  ;;  %s2288_s9 = sand.u32 1, %s2847_s12  }
 0x1dd   : > { %s2289_s15 = scalar_lea.sflag [#allocation3], %s2288_s9 }
 0x1de   : > { %p2710_p9 = pnand %p2713_p7, %p2959_p8 }
 0x1e0   : > { %p2711_p10 = pneg %p2710_p9 }
 0x1e2   : > { %2842 = dma.done.wait (%p2711_p10), %s2289_s15, 2048  }
 0x1e3   : > { %2844 = vsyncadd (%p2711_p10), %s2289_s15, 4294965248  ;;  %s16_s19 = sadd.s32 1, %s2875_s19   ;;  %s3825_s12 = smov %s2851_s13 }
 0x1e4   : > { %p13_p11 = scmp.ge.s32.totalorder %s16_s19, 6   ;;  %s3826_s13 = smov %s2855_s14 }
 0x1e5   : > { %s3827_s14 = smov %s2968_s30  ;;  %s3828_s15 = smov %s2867_s17 }
 0x1e6   : > { %s3829_s16 = smov %s2871_s18  ;;  %s3830_s17 = smov %s3833_s22 }
 0x1e7   : > { %s3831_s18 = smov %s3837_s23  ;;  %15 = sbr.rel (!%p13_p11) target bundleno = 5 (0x5), region = 78 }
 0x1ec   :  { %2295 = vsyncpa [#allocation3], 1 }
 0x1ed   :  { %2297 = vsyncpa [#allocation3 + $0x1], 1 }

</bundles_post_ra>
